<compile_context>
chip_gen: v5e
topology: v5e:2x2
jax: 0.10.0
libtpu: 0.0.40
codegen_flags: <defaults>
</compile_context>

<pallas_src>
import functools

import jax
import jax.numpy as jnp
from jax.experimental import pallas as pl
from jax.experimental.pallas import tpu as pltpu

HIDDEN = 512
LEAK = 0.1


def _leaky_relu(x, alpha=LEAK):
    # alpha * x keeps x's dtype (weak typing), so this runs in bf16 on the
    # bf16 activation path and in f32 otherwise.
    return jnp.where(x > 0, x, alpha * x)


def _round_up(x, m):
    return (x + m - 1) // m * m


def _default_bf16_act():
    """bf16 elementwise on v6e/v7x (bf16 VALUs); f32 elementwise on v5-class
    chips which have no bf16 VPU."""
    try:
        kind = jax.devices()[0].device_kind.lower()
    except Exception:
        return True
    return "v5" not in kind


def mlp_kernel(x_ref, w1_ref, b1_ref, w2_ref, b2_ref, w3_ref, b3_ref,
               w4_ref, b4_ref, o_ref, *, bf16_act):
    # One batch tile per grid step; all bf16 weights resident in VMEM.
    # Matmuls: bf16 operands, f32 accumulation (MXU bf16 peak rate).
    x = x_ref[...].astype(jnp.bfloat16)

    def hidden(h, w_ref, b_ref):
        y = jnp.dot(h, w_ref[...], preferred_element_type=jnp.float32)
        if bf16_act:
            # Cast the MXU result once, then bias + LeakyReLU in bf16
            # (v6e/v7x bf16 VALUs) -> half the activation bytes through the
            # 1(+1) vst slot and half the spill traffic.
            y = y.astype(jnp.bfloat16) + b_ref[...].astype(jnp.bfloat16)
            return _leaky_relu(y)
        # v5e path: keep elementwise work in f32, single downcast at the end.
        y = y + b_ref[...]
        return _leaky_relu(y).astype(jnp.bfloat16)

    h = hidden(x, w1_ref, b1_ref)
    h = hidden(h, w2_ref, b2_ref)
    h = hidden(h, w3_ref, b3_ref)

    # Final layer + tanh in f32 for output precision.
    # NOTE: out_f=16 (<128 lanes) lowers to masked partial stores; output
    # bytes are tiny so padding to 128 lanes is not worth it here.
    y = jnp.dot(h, w4_ref[...], preferred_element_type=jnp.float32) + b4_ref[...]
    o_ref[...] = jnp.tanh(y).astype(o_ref.dtype)


@functools.partial(jax.jit, static_argnames=("block_b", "bf16_act"))
def gen_forward(x, params, block_b=2048, bf16_act=None):
    """Pallas forward pass of Gen.

    x: (B, in_features) float32
    params: dict with w1..w4 (in, out) bf16 and b1..b4 (1, out) f32
    """
    if bf16_act is None:
        bf16_act = _default_bf16_act()

    B, in_f = x.shape
    out_f = params["w4"].shape[1]

    # Batch tile selection:
    #  * cap at block_b (default 2048: well inside a 48 MiB VMEM budget with
    #    double-buffered x/out tiles + resident bf16 weights + activations);
    #  * if B > 256, force >=2 grid steps so the "parallel" axis can shard
    #    across v7x's two TensorCores (and still amortize step overhead).
    bb = min(block_b, B)
    if B > 256:
        bb = min(bb, _round_up(pl.cdiv(B, 2), 128))
    grid = (pl.cdiv(B, bb),)

    # Weight/bias specs: full array, same block every grid step (constant
    # index_map -> never re-fetched between steps).
    def full_spec(shape):
        return pl.BlockSpec(shape, lambda i: (0, 0))

    # Advisory cost estimate so XLA schedules the custom call sensibly.
    flops = 2 * B * (in_f * HIDDEN + 2 * HIDDEN * HIDDEN + HIDDEN * out_f)
    bytes_accessed = (
        x.size * x.dtype.itemsize
        + sum(int(params[k].size) * params[k].dtype.itemsize for k in params)
        + B * out_f * 4)
    cost = pl.CostEstimate(flops=flops,
                           transcendentals=B * out_f,
                           bytes_accessed=bytes_accessed)

    kernel = functools.partial(mlp_kernel, bf16_act=bf16_act)

    return pl.pallas_call(
        kernel,
        out_shape=jax.ShapeDtypeStruct((B, out_f), jnp.float32),
        grid_spec=pltpu.PrefetchScalarGridSpec(
            num_scalar_prefetch=0,
            grid=grid,
            in_specs=[
                pl.BlockSpec((bb, in_f), lambda i: (i, 0)),           # x tile
                full_spec(params["w1"].shape), full_spec(params["b1"].shape),
                full_spec(params["w2"].shape), full_spec(params["b2"].shape),
                full_spec(params["w3"].shape), full_spec(params["b3"].shape),
                full_spec(params["w4"].shape), full_spec(params["b4"].shape),
            ],
            out_specs=pl.BlockSpec((bb, out_f), lambda i: (i, 0)),
        ),
        compiler_params=pltpu.CompilerParams(
            dimension_semantics=("parallel",),
            # Above the v5e/v6e default scoped limits, well under v7x's
            # 64 MiB physical VMEM (leaves double-buffering headroom).
            vmem_limit_bytes=48 * 1024 * 1024),
        cost_estimate=cost,
    )(x, params["w1"], params["b1"], params["w2"], params["b2"],
      params["w3"], params["b3"], params["w4"], params["b4"])


def init_params(key, in_shape, out_shape):
    """Deterministic init mimicking PyTorch nn.Linear default:
    U(-1/sqrt(fan_in), 1/sqrt(fan_in)).  Weights stored as (in, out) bf16,
    biases as (1, out) f32."""
    dims = [(in_shape, HIDDEN), (HIDDEN, HIDDEN), (HIDDEN, HIDDEN),
            (HIDDEN, out_shape)]
    params = {}
    keys = jax.random.split(key, 2 * len(dims))
    for idx, (fin, fout) in enumerate(dims):
        bound = 1.0 / (fin ** 0.5)
        w = jax.random.uniform(keys[2 * idx], (fin, fout), jnp.float32,
                               -bound, bound)
        b = jax.random.uniform(keys[2 * idx + 1], (1, fout), jnp.float32,
                               -bound, bound)
        params[f"w{idx + 1}"] = w.astype(jnp.bfloat16)
        params[f"b{idx + 1}"] = b
    return params


def gen_reference(x, params, bf16_act=True):
    """Pure-JAX reference matching the kernel's numerics (bf16 operands, f32
    MXU accumulation; bias/LeakyReLU in bf16 or f32 matching `bf16_act`).
    NOTE: this diverges from a pure-f32 PyTorch Gen at the ~1e-2 level."""
    h = x.astype(jnp.bfloat16)
    for i in range(1, 4):
        y = jnp.dot(h, params[f"w{i}"], preferred_element_type=jnp.float32)
        if bf16_act:
            y = y.astype(jnp.bfloat16) + params[f"b{i}"].astype(jnp.bfloat16)
            h = jnp.where(y > 0, y, LEAK * y)
        else:
            y = y + params[f"b{i}"]
            h = jnp.where(y > 0, y, LEAK * y).astype(jnp.bfloat16)
    y = jnp.dot(h, params["w4"], preferred_element_type=jnp.float32) + params["b4"]
    return jnp.tanh(y)


if __name__ == "__main__":
    key = jax.random.PRNGKey(0)
    k_param, k_x = jax.random.split(key)

    in_shape, out_shape = 32, 16
    params = init_params(k_param, in_shape, out_shape)
    bf16_act = _default_bf16_act()

    # Small primary check plus a multi-step-grid check (even split across
    # two tiles / two v7x TensorCores) and a ragged-batch check (partial
    # last tile masked on writeback).
    for batch in (8, 512, 260):
        x = jax.random.normal(jax.random.fold_in(k_x, batch),
                              (batch, in_shape), jnp.float32)
        out = gen_forward(x, params)
        out = jax.block_until_ready(out)
        ref = gen_reference(x, params, bf16_act=bf16_act)
        assert out.shape == (batch, out_shape), out.shape
        assert jnp.allclose(out, ref, atol=2e-2, rtol=2e-2), (
            batch, float(jnp.max(jnp.abs(out - ref))))

    print("KERNEL_OK")
</pallas_src>

<mosaic_0001>
module attributes {stable_mosaic.version = 11 : i64} {
  func.func @mlp_kernel(%arg0: i32, %arg1: memref<8x32xf32, #tpu.memory_space<vmem>>, %arg2: memref<32x512xbf16, #tpu.memory_space<vmem>>, %arg3: memref<1x512xf32, #tpu.memory_space<vmem>>, %arg4: memref<512x512xbf16, #tpu.memory_space<vmem>>, %arg5: memref<1x512xf32, #tpu.memory_space<vmem>>, %arg6: memref<512x512xbf16, #tpu.memory_space<vmem>>, %arg7: memref<1x512xf32, #tpu.memory_space<vmem>>, %arg8: memref<512x16xbf16, #tpu.memory_space<vmem>>, %arg9: memref<1x16xf32, #tpu.memory_space<vmem>>, %arg10: memref<8x16xf32, #tpu.memory_space<vmem>>) attributes {dimension_semantics = [#tpu.dimension_semantics<parallel>], iteration_bounds = array<i64: 1>, scalar_prefetch = 0 : i64, scratch_operands = 0 : i64, tpu.core_type = #tpu.core_type<tc>, window_params = [{transform_indices = @transform_0, window_bounds = array<i64: 8, 32>}, {pipeline_mode = #tpu.pipeline_mode<synchronous>, transform_indices = @transform_1, window_bounds = array<i64: 32, 512>}, {pipeline_mode = #tpu.pipeline_mode<synchronous>, transform_indices = @transform_2, window_bounds = array<i64: 1, 512>}, {pipeline_mode = #tpu.pipeline_mode<synchronous>, transform_indices = @transform_3, window_bounds = array<i64: 512, 512>}, {pipeline_mode = #tpu.pipeline_mode<synchronous>, transform_indices = @transform_4, window_bounds = array<i64: 1, 512>}, {pipeline_mode = #tpu.pipeline_mode<synchronous>, transform_indices = @transform_5, window_bounds = array<i64: 512, 512>}, {pipeline_mode = #tpu.pipeline_mode<synchronous>, transform_indices = @transform_6, window_bounds = array<i64: 1, 512>}, {pipeline_mode = #tpu.pipeline_mode<synchronous>, transform_indices = @transform_7, window_bounds = array<i64: 512, 16>}, {pipeline_mode = #tpu.pipeline_mode<synchronous>, transform_indices = @transform_8, window_bounds = array<i64: 1, 16>}, {transform_indices = @transform_9, window_bounds = array<i64: 8, 16>}]} {
    %c0 = arith.constant 0 : index
    %c0_0 = arith.constant 0 : index
    %0 = vector.load %arg1[%c0, %c0_0] : memref<8x32xf32, #tpu.memory_space<vmem>>, vector<8x32xf32>
    %1 = arith.truncf %0 : vector<8x32xf32> to vector<8x32xbf16>
    %c0_1 = arith.constant 0 : index
    %c0_2 = arith.constant 0 : index
    %2 = vector.load %arg2[%c0_1, %c0_2] : memref<32x512xbf16, #tpu.memory_space<vmem>>, vector<32x512xbf16>
    %cst = arith.constant dense<0.000000e+00> : vector<8x512xf32>
    %3 = tpu.matmul %1, %2, %cst {dimension_numbers = #tpu.dot_dimension_numbers<[1], [0], [0], [1], [0, 0, 1, 1], [], []>} : vector<8x32xbf16>, vector<32x512xbf16>, vector<8x512xf32> -> vector<8x512xf32>
    %4 = arith.truncf %3 : vector<8x512xf32> to vector<8x512xbf16>
    %c0_3 = arith.constant 0 : index
    %c0_4 = arith.constant 0 : index
    %5 = vector.load %arg3[%c0_3, %c0_4] : memref<1x512xf32, #tpu.memory_space<vmem>>, vector<1x512xf32>
    %6 = arith.truncf %5 : vector<1x512xf32> to vector<1x512xbf16>
    %7 = vector.broadcast %6 : vector<1x512xbf16> to vector<8x512xbf16>
    %8 = arith.addf %4, %7 : vector<8x512xbf16>
    %cst_5 = arith.constant 0.000000e+00 : bf16
    %9 = vector.broadcast %cst_5 : bf16 to vector<8x512xbf16>
    %10 = arith.cmpf ogt, %8, %9 : vector<8x512xbf16>
    %cst_6 = arith.constant 1.000980e-01 : bf16
    %11 = vector.broadcast %cst_6 : bf16 to vector<8x512xbf16>
    %12 = arith.mulf %11, %8 : vector<8x512xbf16>
    %13 = arith.select %10, %8, %12 : vector<8x512xi1>, vector<8x512xbf16>
    %c0_7 = arith.constant 0 : index
    %c0_8 = arith.constant 0 : index
    %14 = vector.load %arg4[%c0_7, %c0_8] : memref<512x512xbf16, #tpu.memory_space<vmem>>, vector<512x512xbf16>
    %cst_9 = arith.constant dense<0.000000e+00> : vector<8x512xf32>
    %15 = tpu.matmul %13, %14, %cst_9 {dimension_numbers = #tpu.dot_dimension_numbers<[1], [0], [0], [1], [0, 0, 1, 1], [], []>} : vector<8x512xbf16>, vector<512x512xbf16>, vector<8x512xf32> -> vector<8x512xf32>
    %16 = arith.truncf %15 : vector<8x512xf32> to vector<8x512xbf16>
    %c0_10 = arith.constant 0 : index
    %c0_11 = arith.constant 0 : index
    %17 = vector.load %arg5[%c0_10, %c0_11] : memref<1x512xf32, #tpu.memory_space<vmem>>, vector<1x512xf32>
    %18 = arith.truncf %17 : vector<1x512xf32> to vector<1x512xbf16>
    %19 = vector.broadcast %18 : vector<1x512xbf16> to vector<8x512xbf16>
    %20 = arith.addf %16, %19 : vector<8x512xbf16>
    %cst_12 = arith.constant 0.000000e+00 : bf16
    %21 = vector.broadcast %cst_12 : bf16 to vector<8x512xbf16>
    %22 = arith.cmpf ogt, %20, %21 : vector<8x512xbf16>
    %cst_13 = arith.constant 1.000980e-01 : bf16
    %23 = vector.broadcast %cst_13 : bf16 to vector<8x512xbf16>
    %24 = arith.mulf %23, %20 : vector<8x512xbf16>
    %25 = arith.select %22, %20, %24 : vector<8x512xi1>, vector<8x512xbf16>
    %c0_14 = arith.constant 0 : index
    %c0_15 = arith.constant 0 : index
    %26 = vector.load %arg6[%c0_14, %c0_15] : memref<512x512xbf16, #tpu.memory_space<vmem>>, vector<512x512xbf16>
    %cst_16 = arith.constant dense<0.000000e+00> : vector<8x512xf32>
    %27 = tpu.matmul %25, %26, %cst_16 {dimension_numbers = #tpu.dot_dimension_numbers<[1], [0], [0], [1], [0, 0, 1, 1], [], []>} : vector<8x512xbf16>, vector<512x512xbf16>, vector<8x512xf32> -> vector<8x512xf32>
    %28 = arith.truncf %27 : vector<8x512xf32> to vector<8x512xbf16>
    %c0_17 = arith.constant 0 : index
    %c0_18 = arith.constant 0 : index
    %29 = vector.load %arg7[%c0_17, %c0_18] : memref<1x512xf32, #tpu.memory_space<vmem>>, vector<1x512xf32>
    %30 = arith.truncf %29 : vector<1x512xf32> to vector<1x512xbf16>
    %31 = vector.broadcast %30 : vector<1x512xbf16> to vector<8x512xbf16>
    %32 = arith.addf %28, %31 : vector<8x512xbf16>
    %cst_19 = arith.constant 0.000000e+00 : bf16
    %33 = vector.broadcast %cst_19 : bf16 to vector<8x512xbf16>
    %34 = arith.cmpf ogt, %32, %33 : vector<8x512xbf16>
    %cst_20 = arith.constant 1.000980e-01 : bf16
    %35 = vector.broadcast %cst_20 : bf16 to vector<8x512xbf16>
    %36 = arith.mulf %35, %32 : vector<8x512xbf16>
    %37 = arith.select %34, %32, %36 : vector<8x512xi1>, vector<8x512xbf16>
    %c0_21 = arith.constant 0 : index
    %c0_22 = arith.constant 0 : index
    %38 = vector.load %arg8[%c0_21, %c0_22] : memref<512x16xbf16, #tpu.memory_space<vmem>>, vector<512x16xbf16>
    %cst_23 = arith.constant dense<0.000000e+00> : vector<8x16xf32>
    %39 = tpu.matmul %37, %38, %cst_23 {dimension_numbers = #tpu.dot_dimension_numbers<[1], [0], [0], [1], [0, 0, 1, 1], [], []>} : vector<8x512xbf16>, vector<512x16xbf16>, vector<8x16xf32> -> vector<8x16xf32>
    %c0_24 = arith.constant 0 : index
    %c0_25 = arith.constant 0 : index
    %40 = vector.load %arg9[%c0_24, %c0_25] : memref<1x16xf32, #tpu.memory_space<vmem>>, vector<1x16xf32>
    %41 = vector.broadcast %40 : vector<1x16xf32> to vector<8x16xf32>
    %42 = arith.addf %39, %41 : vector<8x16xf32>
    %43 = math.tanh %42 : vector<8x16xf32>
    %c0_26 = arith.constant 0 : index
    %c0_27 = arith.constant 0 : index
    %44 = vector.load %arg10[%c0_26, %c0_27] : memref<8x16xf32, #tpu.memory_space<vmem>>, vector<8x16xf32>
    tpu.vector_store %arg10[%c0_26, %c0_27], %43 {strides = array<i32>} : memref<8x16xf32, #tpu.memory_space<vmem>>, vector<8x16xf32>,
    return
  }
  func.func @transform_0(%arg0: i32) -> (i32, i32) {
    %c0_i32 = arith.constant 0 : i32
    %c0_i32_0 = arith.constant 0 : i32
    return %arg0, %c0_i32 : i32, i32
  }
  func.func @transform_1(%arg0: i32) -> (i32, i32) {
    %c0_i32 = arith.constant 0 : i32
    %c0_i32_0 = arith.constant 0 : i32
    %c0_i32_1 = arith.constant 0 : i32
    return %c0_i32, %c0_i32_0 : i32, i32
  }
  func.func @transform_2(%arg0: i32) -> (i32, i32) {
    %c0_i32 = arith.constant 0 : i32
    %c0_i32_0 = arith.constant 0 : i32
    %c0_i32_1 = arith.constant 0 : i32
    return %c0_i32, %c0_i32_0 : i32, i32
  }
  func.func @transform_3(%arg0: i32) -> (i32, i32) {
    %c0_i32 = arith.constant 0 : i32
    %c0_i32_0 = arith.constant 0 : i32
    %c0_i32_1 = arith.constant 0 : i32
    return %c0_i32, %c0_i32_0 : i32, i32
  }
  func.func @transform_4(%arg0: i32) -> (i32, i32) {
    %c0_i32 = arith.constant 0 : i32
    %c0_i32_0 = arith.constant 0 : i32
    %c0_i32_1 = arith.constant 0 : i32
    return %c0_i32, %c0_i32_0 : i32, i32
  }
  func.func @transform_5(%arg0: i32) -> (i32, i32) {
    %c0_i32 = arith.constant 0 : i32
    %c0_i32_0 = arith.constant 0 : i32
    %c0_i32_1 = arith.constant 0 : i32
    return %c0_i32, %c0_i32_0 : i32, i32
  }
  func.func @transform_6(%arg0: i32) -> (i32, i32) {
    %c0_i32 = arith.constant 0 : i32
    %c0_i32_0 = arith.constant 0 : i32
    %c0_i32_1 = arith.constant 0 : i32
    return %c0_i32, %c0_i32_0 : i32, i32
  }
  func.func @transform_7(%arg0: i32) -> (i32, i32) {
    %c0_i32 = arith.constant 0 : i32
    %c0_i32_0 = arith.constant 0 : i32
    %c0_i32_1 = arith.constant 0 : i32
    return %c0_i32, %c0_i32_0 : i32, i32
  }
  func.func @transform_8(%arg0: i32) -> (i32, i32) {
    %c0_i32 = arith.constant 0 : i32
    %c0_i32_0 = arith.constant 0 : i32
    %c0_i32_1 = arith.constant 0 : i32
    return %c0_i32, %c0_i32_0 : i32, i32
  }
  func.func @transform_9(%arg0: i32) -> (i32, i32) {
    %c0_i32 = arith.constant 0 : i32
    %c0_i32_0 = arith.constant 0 : i32
    return %arg0, %c0_i32 : i32, i32
  }
}

</mosaic_0001>

<bundles_post_ra>
// kernel: gen_forward.1
= control target key start
LH: loop header
LB: loop body
LE: loop exit
PB: predicated region body
PF: predicated region fallthrough
CT: control target
= control target key end

     0   :  { %14 = vsyncpa [#allocation3], 0  ;;  %s4644_s0 = inlined_call_operand.vmem [shape: f32[8,32], index: 0, kind: input, shape index: {}]   ;;  %s4645_s1 = inlined_call_operand.vmem [shape: bf16[32,512], index: 1, kind: input, shape index: {}]   ;;  %s4646_s2 = inlined_call_operand.vmem [shape: f32[1,512], index: 2, kind: input, shape index: {}]   ;;  %s4647_s3 = inlined_call_operand.hbm [shape: bf16[512,512], index: 3, kind: input, shape index: {}]   ;;  %s4648_s4 = inlined_call_operand.vmem [shape: f32[1,512], index: 4, kind: input, shape index: {}]   ;;  %s4649_s5 = inlined_call_operand.hbm [shape: bf16[512,512], index: 5, kind: input, shape index: {}]   ;;  %s4650_s6 = inlined_call_operand.vmem [shape: f32[1,512], index: 6, kind: input, shape index: {}]   ;;  %s4651_s7 = inlined_call_operand.vmem [shape: bf16[512,16], index: 7, kind: input, shape index: {}]   ;;  %s4652_s8 = inlined_call_operand.vmem [shape: f32[1,16], index: 8, kind: input, shape index: {}]   ;;  %s4653_s9 = inlined_call_operand.hbm [shape: f32[8,16], index: 9, kind: output, shape index: {}]  }
   0x1   :  { %15 = vsyncpa [#allocation6], 0 }
   0x2   :  { %16 = vsyncpa [#allocation4], 0  ;;  %s27_s11 = sshll.u32 %s4647_s3, 4  ;;  %s4285_s12 = smov [#allocation2]   ;;  %s28_s11 = int_to_ptr.hbm [resolvable:$true] %s27_s11 }
   0x3   :  { %s29_s13 = sshll.u32 %s4285_s12, 4  ;;  %s42_s16 = sshll.u32 %s4649_s5, 4  ;;  %s30_s13 = int_to_ptr.vmem [resolvable:$true] %s29_s13  ;;  %s43_s16 = int_to_ptr.hbm [resolvable:$true] %s42_s16 }
   0x4   :  { %s4286_s17 = smov 256   ;;  %s4287_s18 = smov 16  }
   0x5   :  { %35 = dma.hbm_to_vmem [thread:$0]  %s28_s11, 16384, %s30_s13, [#allocation3], %s4286_s17, %s4286_s17, %s4287_s18  }
   0x6   :  { %s4288_s19 = smov [#allocation5]  }
   0x7   :  { %s44_s20 = sshll.u32 %s4288_s19, 4  ;;  %s45_s20 = int_to_ptr.vmem [resolvable:$true] %s44_s20 }
   0x8   :  { %50 = dma.hbm_to_vmem [thread:$0]  %s43_s16, 16384, %s45_s20, [#allocation6], %s4286_s17, %s4286_s17, %s4287_s18  }
   0x9   :  { %4279 = dma.done.wait [#allocation3], 16384  }
   0xa   :  { %4280 = vsyncadd [#allocation3], 4294950912 }
   0xb   :  { %4281 = dma.done.wait [#allocation6], 16384  }
   0xc   :  { %4282 = vsyncadd [#allocation6], 4294950912  ;;  %v2733_v0 = vld [vmem:[%s4645_s1 + $0x20] sm:$0xf]  ;;  %v3909_v1 = vld [vmem:[%s4645_s1 + $0x2c] sm:$0xf0] }
   0xd   :  { %v3907_v2 = vld [vmem:[%s4645_s1 + $0x24] sm:$0xf]  ;;  %v2734_v3 = vor.u32 %v3909_v1, %v2733_v0  ;;  %v2735_v4 = vld [vmem:[%s4645_s1 + $0x30] sm:$0xf0]  ;;  %v2741_v5 = vld [vmem:[%s4645_s1 + $0x28] sm:$0xf] }
   0xe   :  { %v3910_v6 = vld [vmem:[%s4645_s1 + $0x34] sm:$0xf0]  ;;  %v2738_v7 = vor.u32 %v3907_v2, %v2735_v4  ;;  %v3908_v9 = vld [vmem:[%s4645_s1 + $0x2c] sm:$0xf]  ;;  %v2743_v10 = vld [vmem:[%s4645_s1 + $0x38] sm:$0xf0] }
   0xf   :  { %v2742_v8 = vor.u32 %v3910_v6, %v2741_v5  ;;  %v2717_v11 = vld [vmem:[%s4645_s1] sm:$0xf]  ;;  %126 = vmatpush.bf16.msra.mxu0 %v2734_v3  ;;  %v2746_v12 = vor.u32 %v3908_v9, %v2743_v10  ;;  %v3905_v13 = vld [vmem:[%s4645_s1 + $0xc] sm:$0xf0]  ;;  %v3903_v14 = vld [vmem:[%s4645_s1 + $0x4] sm:$0xf] }
  0x10   :  { %v2719_v15 = vld [vmem:[%s4645_s1 + $0x10] sm:$0xf0]  ;;  %139 = vmatpush.bf16.msra.mxu1 %v2738_v7  ;;  %v2718_v16 = vor.u32 %v3905_v13, %v2717_v11  ;;  %v2725_v18 = vld [vmem:[%s4645_s1 + $0x8] sm:$0xf]  ;;  %v3906_v19 = vld [vmem:[%s4645_s1 + $0x14] sm:$0xf0] }
  0x11   :  { %152 = vmatpush.bf16.msra.mxu2 %v2742_v8  ;;  %v2722_v17 = vor.u32 %v3903_v14, %v2719_v15  ;;  %v3904_v20 = vld [vmem:[%s4645_s1 + $0xc] sm:$0xf]  ;;  %165 = vmatpush.bf16.msra.mxu3 %v2746_v12  ;;  %v2726_v21 = vor.u32 %v3906_v19, %v2725_v18  ;;  %v2727_v22 = vld [vmem:[%s4645_s1 + $0x18] sm:$0xf0]  ;;  %v66_v23 = vld [vmem:[%s4644_s0] sm:$0xff]  ;;  %vm116_vm0 = vcmask 261120  }
  0x12   :  { %v2865_v24 = vld [vmem:[#allocation2 + $0xe0] sm:$0xf]  ;;  %v2730_v25 = vor.u32 %v3904_v20, %v2727_v22  ;;  %v67_v26 = vpack.c.bf16 %v66_v23, %v66_v23  ;;  %v3941_v27 = vld [vmem:[#allocation2 + $0xec] sm:$0xf0]  ;;  %s4289_s20 = smov [#allocation7]   ;;  %s2704_s23 = sshll.u32 %s4653_s9, 4  ;;  %s2705_s23 = int_to_ptr.hbm [resolvable:$true] %s2704_s23 }
  0x13   :  { %v2993_v28 = vld [vmem:[#allocation2 + $0x1e0] sm:$0xf]  ;;  %v3973_v29 = vld [vmem:[#allocation2 + $0x1ec] sm:$0xf0]  ;;  %127 = vmatpush.bf16.msra.mxu0 %v2718_v16  ;;  %v2866_v30 = vor.u32 %v3941_v27, %v2865_v24  ;;  %s2702_s3 = sshll.u32 %s4289_s20, 4  ;;  %s2703_s3 = int_to_ptr.vmem [resolvable:$true] %s2702_s3 }
  0x14   :  { %v2994_v31 = vor.u32 %v3973_v29, %v2993_v28  ;;  %v2849_v32 = vld [vmem:[#allocation2 + $0xc0] sm:$0xf]  ;;  %v3937_v33 = vld [vmem:[#allocation2 + $0xcc] sm:$0xf0]  ;;  %140 = vmatpush.bf16.msra.mxu1 %v2722_v17 }
  0x15   :  { %v2977_v34 = vld [vmem:[#allocation2 + $0x1c0] sm:$0xf]  ;;  %153 = vmatpush.bf16.msra.mxu2 %v2726_v21  ;;  %v3969_v35 = vld [vmem:[#allocation2 + $0x1cc] sm:$0xf0]  ;;  %166 = vmatpush.bf16.msra.mxu3 %v2730_v25  ;;  %v2850_v38 = vor.u32 %v3937_v33, %v2849_v32 }
  0x16   :  { %v3121_v36 = vld [vmem:[#allocation2 + $0x2e0] sm:$0xf]  ;;  %v4005_v37 = vld [vmem:[#allocation2 + $0x2ec] sm:$0xf0]  ;;  %2747 = vmatmul.msk.bf16.vlgmr.msra.gmra.mxu0 %vm116_vm0, %v67_v26  ;;  %v2978_v43 = vor.u32 %v3969_v35, %v2977_v34 }
  0x17   :  { %1026 = vmatpush.bf16.msrb.mxu0 %v2866_v30  ;;  %v3122_v39 = vor.u32 %v4005_v37, %v3121_v36  ;;  %v3249_v40 = vld [vmem:[#allocation2 + $0x3e0] sm:$0xf]  ;;  %v4037_v41 = vld [vmem:[#allocation2 + $0x3ec] sm:$0xf0]  ;;  %2748 = vmatmul.msk.bf16.vlgmr.msra.gmra.mxu1 %vm116_vm0, %v67_v26 }
  0x18   :  { %v2833_v42 = vld [vmem:[#allocation2 + $0xa0] sm:$0xf]  ;;  %1039 = vmatpush.bf16.msrb.mxu1 %v2994_v31  ;;  %v3250_v44 = vor.u32 %v4037_v41, %v3249_v40  ;;  %v3933_v45 = vld [vmem:[#allocation2 + $0xac] sm:$0xf0]  ;;  %2749 = vmatmul.msk.bf16.vlgmr.msra.gmra.mxu2 %vm116_vm0, %v67_v26 }
  0x19   :  { %v2961_v46 = vld [vmem:[#allocation2 + $0x1a0] sm:$0xf]  ;;  %v3965_v47 = vld [vmem:[#allocation2 + $0x1ac] sm:$0xf0]  ;;  %2750 = vmatmul.msk.bf16.vlgmr.msra.gmra.mxu3 %vm116_vm0, %v67_v26  ;;  %1052 = vmatpush.bf16.msrb.mxu2 %v3122_v39  ;;  %v2834_v53 = vor.u32 %v3933_v45, %v2833_v42 }
  0x1a   :  { %v3105_v48 = vld [vmem:[#allocation2 + $0x2c0] sm:$0xf]  ;;  %v4001_v49 = vld [vmem:[#allocation2 + $0x2cc] sm:$0xf0]  ;;  %1065 = vmatpush.bf16.msrb.mxu3 %v3250_v44  ;;  %v2962_v58 = vor.u32 %v3965_v47, %v2961_v46 }
  0x1b   :  { %v3233_v50 = vld [vmem:[#allocation2 + $0x3c0] sm:$0xf]  ;;  %v3106_v51 = vor.u32 %v4001_v49, %v3105_v48  ;;  %v4033_v52 = vld [vmem:[#allocation2 + $0x3cc] sm:$0xf0]  ;;  %1027 = vmatpush.bf16.msrb.mxu0 %v2850_v38  ;;  %v3939_v48 = vld [vmem:[#allocation2 + $0xe4] sm:$0xf] }
  0x1c   :  { %v3234_v54 = vor.u32 %v4033_v52, %v3233_v50  ;;  %v2817_v55 = vld [vmem:[#allocation2 + $0x80] sm:$0xf]  ;;  %v3929_v56 = vld [vmem:[#allocation2 + $0x8c] sm:$0xf0]  ;;  %1040 = vmatpush.bf16.msrb.mxu1 %v2978_v43  ;;  %v2867_v49 = vld [vmem:[#allocation2 + $0xf0] sm:$0xf0] }
  0x1d   :  { %v3089_v57 = vld [vmem:[#allocation2 + $0x2a0] sm:$0xf]  ;;  %v3997_v59 = vld [vmem:[#allocation2 + $0x2ac] sm:$0xf0]  ;;  %1053 = vmatpush.bf16.msrb.mxu2 %v3106_v51  ;;  %v2818_v1 = vor.u32 %v3929_v56, %v2817_v55  ;;  %v3971_v50 = vld [vmem:[#allocation2 + $0x1e4] sm:$0xf] }
  0x1e   :  { %v3217_v60 = vld [vmem:[#allocation2 + $0x3a0] sm:$0xf]  ;;  %v4029_v61 = vld [vmem:[#allocation2 + $0x3ac] sm:$0xf0]  ;;  %v3090_v0 = vor.u32 %v3997_v59, %v3089_v57  ;;  %1066 = vmatpush.bf16.msrb.mxu3 %v3234_v54  ;;  %v2995_v51 = vld [vmem:[#allocation2 + $0x1f0] sm:$0xf0] }
  0x1f   :  { %v2945_v62 = vld [vmem:[#allocation2 + $0x180] sm:$0xf]  ;;  %v3961_v63 = vld [vmem:[#allocation2 + $0x18c] sm:$0xf0]  ;;  %1028 = vmatpush.bf16.msrb.mxu0 %v2834_v53  ;;  %v3218_v2 = vor.u32 %v4029_v61, %v3217_v60  ;;  %v3935_v55 = vld [vmem:[#allocation2 + $0xc4] sm:$0xf]  ;;  %v2870_v60 = vor.u32 %v3939_v48, %v2867_v49 }
  0x20   :  { %v2801_v3 = vld [vmem:[#allocation2 + $0x60] sm:$0xf]  ;;  %v3993_v5 = vld [vmem:[#allocation2 + $0x28c] sm:$0xf0]  ;;  %1041 = vmatpush.bf16.msrb.mxu1 %v2962_v58  ;;  %v2946_v6 = vor.u32 %v3961_v63, %v2945_v62  ;;  %v4003_v62 = vld [vmem:[#allocation2 + $0x2e4] sm:$0xf] }
  0x21   :  { %v3073_v4 = vld [vmem:[#allocation2 + $0x280] sm:$0xf]  ;;  %v3925_v7 = vld [vmem:[#allocation2 + $0x6c] sm:$0xf0]  ;;  %1054 = vmatpush.bf16.msrb.mxu2 %v3090_v0  ;;  %v3123_v63 = vld [vmem:[#allocation2 + $0x2f0] sm:$0xf0]  ;;  %v2998_v0 = vor.u32 %v3971_v50, %v2995_v51 }
  0x22   :  { %v3201_v8 = vld [vmem:[#allocation2 + $0x380] sm:$0xf]  ;;  %v4025_v9 = vld [vmem:[#allocation2 + $0x38c] sm:$0xf0]  ;;  %v3074_v12 = vor.u32 %v3993_v5, %v3073_v4  ;;  %1067 = vmatpush.bf16.msrb.mxu3 %v3218_v2  ;;  %v2802_v13 = vor.u32 %v3925_v7, %v2801_v3  ;;  %v4035_v2 = vld [vmem:[#allocation2 + $0x3e4] sm:$0xf] }
  0x23   :  { %v2929_v10 = vld [vmem:[#allocation2 + $0x160] sm:$0xf]  ;;  %v3957_v11 = vld [vmem:[#allocation2 + $0x16c] sm:$0xf0]  ;;  %1029 = vmatpush.bf16.msrb.mxu0 %v2818_v1  ;;  %v3202_v14 = vor.u32 %v4025_v9, %v3201_v8  ;;  %v2851_v1 = vld [vmem:[#allocation2 + $0xd0] sm:$0xf0]  ;;  %v3126_v8 = vor.u32 %v4003_v62, %v3123_v63 }
  0x24   :  { %v2785_v15 = vld [vmem:[#allocation2 + $0x40] sm:$0xf]  ;;  %v3989_v17 = vld [vmem:[#allocation2 + $0x26c] sm:$0xf0]  ;;  %1042 = vmatpush.bf16.msrb.mxu1 %v2946_v6  ;;  %v2930_v18 = vor.u32 %v3957_v11, %v2929_v10  ;;  %v3251_v3 = vld [vmem:[#allocation2 + $0x3f0] sm:$0xf0]  ;;  %v2854_v9 = vor.u32 %v3935_v55, %v2851_v1 }
  0x25   :  { %v3057_v16 = vld [vmem:[#allocation2 + $0x260] sm:$0xf]  ;;  %v3921_v19 = vld [vmem:[#allocation2 + $0x4c] sm:$0xf0]  ;;  %1055 = vmatpush.bf16.msrb.mxu2 %v3074_v12  ;;  %v3967_v4 = vld [vmem:[#allocation2 + $0x1c4] sm:$0xf]  ;;  %v3254_v10 = vor.u32 %v4035_v2, %v3251_v3 }
  0x26   :  { %v3185_v20 = vld [vmem:[#allocation2 + $0x360] sm:$0xf]  ;;  %v4021_v21 = vld [vmem:[#allocation2 + $0x36c] sm:$0xf0]  ;;  %v3058_v24 = vor.u32 %v3989_v17, %v3057_v16  ;;  %1068 = vmatpush.bf16.msrb.mxu3 %v3202_v14  ;;  %v2786_v25 = vor.u32 %v3921_v19, %v2785_v15  ;;  %v2979_v5 = vld [vmem:[#allocation2 + $0x1d0] sm:$0xf0] }
  0x27   :  { %v2913_v22 = vld [vmem:[#allocation2 + $0x140] sm:$0xf]  ;;  %v3953_v23 = vld [vmem:[#allocation2 + $0x14c] sm:$0xf0]  ;;  %1030 = vmatpush.bf16.msrb.mxu0 %v2802_v13  ;;  %v3186_v26 = vor.u32 %v4021_v21, %v3185_v20  ;;  %v2982_v11 = vor.u32 %v3967_v4, %v2979_v5  ;;  %v3931_v12 = vld [vmem:[#allocation2 + $0xa4] sm:$0xf] }
  0x28   :  { %v2769_v27 = vld [vmem:[#allocation2 + $0x20] sm:$0xf]  ;;  %v3985_v29 = vld [vmem:[#allocation2 + $0x24c] sm:$0xf0]  ;;  %1043 = vmatpush.bf16.msrb.mxu1 %v2930_v18  ;;  %v2914_v30 = vor.u32 %v3953_v23, %v2913_v22  ;;  %v2835_v13 = vld [vmem:[#allocation2 + $0xb0] sm:$0xf0] }
  0x29   :  { %v3041_v28 = vld [vmem:[#allocation2 + $0x240] sm:$0xf]  ;;  %v3917_v31 = vld [vmem:[#allocation2 + $0x2c] sm:$0xf0]  ;;  %1056 = vmatpush.bf16.msrb.mxu2 %v3058_v24  ;;  %v3963_v14 = vld [vmem:[#allocation2 + $0x1a4] sm:$0xf]  ;;  %v2838_v16 = vor.u32 %v3931_v12, %v2835_v13 }
  0x2a   :  { %v3169_v32 = vld [vmem:[#allocation2 + $0x340] sm:$0xf]  ;;  %v4017_v33 = vld [vmem:[#allocation2 + $0x34c] sm:$0xf0]  ;;  %v3042_v36 = vor.u32 %v3985_v29, %v3041_v28  ;;  %1069 = vmatpush.bf16.msrb.mxu3 %v3186_v26  ;;  %v2770_v38 = vor.u32 %v3917_v31, %v2769_v27  ;;  %v2963_v15 = vld [vmem:[#allocation2 + $0x1b0] sm:$0xf0] }
  0x2b   :  { %v2897_v34 = vld [vmem:[#allocation2 + $0x120] sm:$0xf]  ;;  %v3949_v35 = vld [vmem:[#allocation2 + $0x12c] sm:$0xf0]  ;;  %1031 = vmatpush.bf16.msrb.mxu0 %v2786_v25  ;;  %v3170_v39 = vor.u32 %v4017_v33, %v3169_v32  ;;  %v2966_v17 = vor.u32 %v3963_v14, %v2963_v15  ;;  %v3999_v18 = vld [vmem:[#allocation2 + $0x2c4] sm:$0xf] }
  0x2c   :  { %v2753_v37 = vld [vmem:[#allocation2] sm:$0xf]  ;;  %v3913_v40 = vld [vmem:[#allocation2 + $0xc] sm:$0xf0]  ;;  %1044 = vmatpush.bf16.msrb.mxu1 %v2914_v30  ;;  %v2898_v43 = vor.u32 %v3949_v35, %v2897_v34  ;;  %v3107_v19 = vld [vmem:[#allocation2 + $0x2d0] sm:$0xf0] }
  0x2d   :  { %v3025_v41 = vld [vmem:[#allocation2 + $0x220] sm:$0xf]  ;;  %v3981_v42 = vld [vmem:[#allocation2 + $0x22c] sm:$0xf0]  ;;  %1057 = vmatpush.bf16.msrb.mxu2 %v3042_v36  ;;  %v2754_v53 = vor.u32 %v3913_v40, %v2753_v37  ;;  %v4031_v20 = vld [vmem:[#allocation2 + $0x3c4] sm:$0xf]  ;;  %v3110_v21 = vor.u32 %v3999_v18, %v3107_v19 }
  0x2e   :  { %v2881_v44 = vld [vmem:[#allocation2 + $0x100] sm:$0xf]  ;;  %v4013_v46 = vld [vmem:[#allocation2 + $0x32c] sm:$0xf0]  ;;  %v3026_v52 = vor.u32 %v3981_v42, %v3025_v41  ;;  %1070 = vmatpush.bf16.msrb.mxu3 %v3170_v39  ;;  %v3235_v22 = vld [vmem:[#allocation2 + $0x3d0] sm:$0xf0] }
  0x2f   :  { %v3153_v45 = vld [vmem:[#allocation2 + $0x320] sm:$0xf]  ;;  %v3945_v47 = vld [vmem:[#allocation2 + $0x10c] sm:$0xf0]  ;;  %1032 = vmatpush.bf16.msrb.mxu0 %v2770_v38  ;;  %v3238_v23 = vor.u32 %v4031_v20, %v3235_v22  ;;  %v3927_v24 = vld [vmem:[#allocation2 + $0x84] sm:$0xf] }
  0x30   :  { %v3154_v54 = vor.u32 %v4013_v46, %v3153_v45  ;;  %v3009_v56 = vld [vmem:[#allocation2 + $0x200] sm:$0xf]  ;;  %v3977_v57 = vld [vmem:[#allocation2 + $0x20c] sm:$0xf0]  ;;  %1045 = vmatpush.bf16.msrb.mxu1 %v2898_v43  ;;  %v2882_v59 = vor.u32 %v3945_v47, %v2881_v44  ;;  %v2819_v25 = vld [vmem:[#allocation2 + $0x90] sm:$0xf0] }
  0x31   :  { %v3137_v58 = vld [vmem:[#allocation2 + $0x300] sm:$0xf]  ;;  %v4009_v61 = vld [vmem:[#allocation2 + $0x30c] sm:$0xf0]  ;;  %1058 = vmatpush.bf16.msrb.mxu2 %v3026_v52  ;;  %v3010_v6 = vor.u32 %v3977_v57, %v3009_v56  ;;  %v3959_v26 = vld [vmem:[#allocation2 + $0x184] sm:$0xf]  ;;  %v2822_v27 = vor.u32 %v3927_v24, %v2819_v25 }
  0x32   :  { %1071 = vmatpush.bf16.msrb.mxu3 %v3154_v54  ;;  %v3138_v7 = vor.u32 %v4009_v61, %v3137_v58  ;;  %v2947_v28 = vld [vmem:[#allocation2 + $0x190] sm:$0xf0]  ;;  %v3995_v30 = vld [vmem:[#allocation2 + $0x2a4] sm:$0xf]  ;;  %v4404_v39 = vld [vmem:[%s4646_s2] sm:$0xf] }
  0x33   :  { %1033 = vmatpush.bf16.msrb.mxu0 %v2754_v53  ;;  %v2950_v29 = vor.u32 %v3959_v26, %v2947_v28  ;;  %v3091_v31 = vld [vmem:[#allocation2 + $0x2b0] sm:$0xf0]  ;;  %v4027_v32 = vld [vmem:[#allocation2 + $0x3a4] sm:$0xf]  ;;  %v176_v48 = vperm.slane %v4404_v39, 0  ;;  %v177_v49 = vperm.slane %v4404_v39, 1 }
  0x34   :  { %1046 = vmatpush.bf16.msrb.mxu1 %v2882_v59  ;;  %v3094_v33 = vor.u32 %v3995_v30, %v3091_v31  ;;  %v3219_v34 = vld [vmem:[#allocation2 + $0x3b0] sm:$0xf0]  ;;  %v3923_v36 = vld [vmem:[#allocation2 + $0x64] sm:$0xf] }
  0x35   :  { %1059 = vmatpush.bf16.msrb.mxu2 %v3010_v6  ;;  %v3222_v35 = vor.u32 %v4027_v32, %v3219_v34  ;;  %v2803_v37 = vld [vmem:[#allocation2 + $0x70] sm:$0xf0]  ;;  %v3955_v38 = vld [vmem:[#allocation2 + $0x164] sm:$0xf]  ;;  %v184_v62 = vpack.c.bf16 %v177_v49, %v176_v48 }
  0x36   :  { %1072 = vmatpush.bf16.msrb.mxu3 %v3138_v7  ;;  %v2806_v40 = vor.u32 %v3923_v36, %v2803_v37  ;;  %v2931_v41 = vld [vmem:[#allocation2 + $0x170] sm:$0xf0]  ;;  %v3991_v43 = vld [vmem:[#allocation2 + $0x284] sm:$0xf] }
  0x37   :  { %1078 = vmatpush.bf16.msra.mxu0 %v2870_v60  ;;  %v2934_v42 = vor.u32 %v3955_v38, %v2931_v41  ;;  %v3075_v44 = vld [vmem:[#allocation2 + $0x290] sm:$0xf0]  ;;  %v4023_v45 = vld [vmem:[#allocation2 + $0x384] sm:$0xf]  ;;  %v188_v13 = vunpack.c.l.b16 %v184_v62  ;;  %v189_v14 = vunpack.c.h.b16 %v184_v62 }
  0x38   :  { %1091 = vmatpush.bf16.msra.mxu1 %v2998_v0  ;;  %v3078_v46 = vor.u32 %v3991_v43, %v3075_v44  ;;  %v3203_v47 = vld [vmem:[#allocation2 + $0x390] sm:$0xf0]  ;;  %v3919_v51 = vld [vmem:[#allocation2 + $0x44] sm:$0xf] }
  0x39   :  { %1104 = vmatpush.bf16.msra.mxu2 %v3126_v8  ;;  %v3206_v50 = vor.u32 %v4023_v45, %v3203_v47  ;;  %v2787_v52 = vld [vmem:[#allocation2 + $0x50] sm:$0xf0]  ;;  %v3951_v54 = vld [vmem:[#allocation2 + $0x144] sm:$0xf]  ;;  %v193_v28 = vpack.c.b16 %v189_v14, %v189_v14  ;;  %v3942_v14 = vld [vmem:[#allocation2 + $0xf4] sm:$0xf0] }
  0x3a   :  { %1117 = vmatpush.bf16.msra.mxu3 %v3254_v10  ;;  %v2790_v53 = vor.u32 %v3919_v51, %v2787_v52  ;;  %v2915_v55 = vld [vmem:[#allocation2 + $0x150] sm:$0xf0]  ;;  %v3987_v57 = vld [vmem:[#allocation2 + $0x264] sm:$0xf]  ;;  %v179_v10 = vperm.slane %v4404_v39, 3 }
  0x3b   :  { %1079 = vmatpush.bf16.msra.mxu0 %v2854_v9  ;;  %v2918_v56 = vor.u32 %v3951_v54, %v2915_v55  ;;  %v3059_v58 = vld [vmem:[#allocation2 + $0x270] sm:$0xf0]  ;;  %v4019_v59 = vld [vmem:[#allocation2 + $0x364] sm:$0xf]  ;;  %v178_v9 = vperm.slane %v4404_v39, 2  ;;  %v201_v39 = vpack.i.b16 %v193_v28, %v193_v28 }
  0x3c   :  { %1092 = vmatpush.bf16.msra.mxu1 %v2982_v11  ;;  %v3062_v60 = vor.u32 %v3987_v57, %v3059_v58  ;;  %v3187_v61 = vld [vmem:[#allocation2 + $0x370] sm:$0xf0]  ;;  %v3915_v0 = vld [vmem:[#allocation2 + $0x24] sm:$0xf] }
  0x3d   :  { %1105 = vmatpush.bf16.msra.mxu2 %v3110_v21  ;;  %v3190_v63 = vor.u32 %v4019_v59, %v3187_v61  ;;  %v2771_v1 = vld [vmem:[#allocation2 + $0x30] sm:$0xf0]  ;;  %v3947_v2 = vld [vmem:[#allocation2 + $0x124] sm:$0xf]  ;;  %v203_v44 = vperm.slane %v201_v39, 0 }
  0x3e   :  { %1118 = vmatpush.bf16.msra.mxu3 %v3238_v23  ;;  %v2774_v3 = vor.u32 %v3915_v0, %v2771_v1  ;;  %v2899_v4 = vld [vmem:[#allocation2 + $0x130] sm:$0xf0]  ;;  %v3983_v6 = vld [vmem:[#allocation2 + $0x244] sm:$0xf]  ;;  %v185_v23 = vpack.c.bf16 %v179_v10, %v178_v9  ;;  %v4038_v39 = vld [vmem:[#allocation2 + $0x3f4] sm:$0xf0] }
  0x3f   :  { %1080 = vmatpush.bf16.msra.mxu0 %v2838_v16  ;;  %v2902_v5 = vor.u32 %v3947_v2, %v2899_v4  ;;  %v3043_v7 = vld [vmem:[#allocation2 + $0x250] sm:$0xf0]  ;;  %v4015_v8 = vld [vmem:[#allocation2 + $0x344] sm:$0xf]  ;;  %v217_v51 = vunpack.c.l.bf16 %v203_v44 }
  0x40   :  { %1093 = vmatpush.bf16.msra.mxu1 %v2966_v17  ;;  %v3046_v11 = vor.u32 %v3983_v6, %v3043_v7  ;;  %v3171_v12 = vld [vmem:[#allocation2 + $0x350] sm:$0xf0]  ;;  %v3911_v16 = vld [vmem:[#allocation2 + $0x4] sm:$0xf]  ;;  %v190_v34 = vunpack.c.l.b16 %v185_v23 }
  0x41   :  { %1106 = vmatpush.bf16.msra.mxu2 %v3094_v33  ;;  %v3174_v15 = vor.u32 %v4015_v8, %v3171_v12  ;;  %v2755_v17 = vld [vmem:[#allocation2 + $0x10] sm:$0xf0]  ;;  %v3943_v18 = vld [vmem:[#allocation2 + $0x104] sm:$0xf] }
  0x42   :  { %1119 = vmatpush.bf16.msra.mxu3 %v3222_v35  ;;  %v2758_v19 = vor.u32 %v3911_v16, %v2755_v17  ;;  %v2883_v20 = vld [vmem:[#allocation2 + $0x110] sm:$0xf0]  ;;  %v3979_v22 = vld [vmem:[#allocation2 + $0x224] sm:$0xf]  ;;  %v191_v35 = vunpack.c.h.b16 %v185_v23  ;;  %v194_v41 = vpack.c.b16 %v190_v34, %v190_v34  ;;  %v3974_v16 = vld [vmem:[#allocation2 + $0x1f4] sm:$0xf0] }
  0x43   :  { %1081 = vmatpush.bf16.msra.mxu0 %v2822_v27  ;;  %v2886_v21 = vor.u32 %v3943_v18, %v2883_v20  ;;  %v3027_v24 = vld [vmem:[#allocation2 + $0x230] sm:$0xf0]  ;;  %v4011_v25 = vld [vmem:[#allocation2 + $0x324] sm:$0xf]  ;;  %v192_v27 = vpack.c.b16 %v188_v13, %v188_v13  ;;  %v3918_v34 = vld [vmem:[#allocation2 + $0x34] sm:$0xf0] }
  0x44   :  { %1094 = vmatpush.bf16.msra.mxu1 %v2950_v29  ;;  %v3155_v26 = vld [vmem:[#allocation2 + $0x330] sm:$0xf0]  ;;  %v3030_v29 = vor.u32 %v3979_v22, %v3027_v24  ;;  %v3975_v31 = vld [vmem:[#allocation2 + $0x204] sm:$0xf]  ;;  %v205_v47 = vpack.i.b16 %v194_v41, %v194_v41 }
  0x45   :  { %1107 = vmatpush.bf16.msra.mxu2 %v3078_v46  ;;  %v3158_v30 = vor.u32 %v4011_v25, %v3155_v26  ;;  %v3011_v32 = vld [vmem:[#allocation2 + $0x210] sm:$0xf0]  ;;  %v4007_v33 = vld [vmem:[#allocation2 + $0x304] sm:$0xf]  ;;  %v197_v38 = vpack.i.b16 %v192_v27, %v192_v27  ;;  %v2857_v25 = vld [vmem:[#allocation2 + $0xc8] sm:$0xf] }
  0x46   :  { %1120 = vmatpush.bf16.msra.mxu3 %v3206_v50  ;;  %v3014_v36 = vor.u32 %v3975_v31, %v3011_v32  ;;  %v3139_v37 = vld [vmem:[#allocation2 + $0x310] sm:$0xf0]  ;;  %v207_v54 = vperm.slane %v205_v47, 0  ;;  %v3938_v26 = vld [vmem:[#allocation2 + $0xd4] sm:$0xf0] }
  0x47   :  { %1082 = vmatpush.bf16.msra.mxu0 %v2806_v40  ;;  %v3142_v40 = vor.u32 %v4007_v33, %v3139_v37  ;;  %v199_v43 = vperm.slane %v197_v38, 0  ;;  %v2985_v31 = vld [vmem:[#allocation2 + $0x1c8] sm:$0xf]  ;;  %v3970_v32 = vld [vmem:[#allocation2 + $0x1d4] sm:$0xf0] }
  0x48   :  { %1095 = vmatpush.bf16.msra.mxu1 %v2934_v42  ;;  %v195_v42 = vpack.c.b16 %v191_v35, %v191_v35  ;;  %v3129_v35 = vld [vmem:[#allocation2 + $0x2e8] sm:$0xf]  ;;  %v4006_v37 = vld [vmem:[#allocation2 + $0x2f4] sm:$0xf0]  ;;  %v2986_v41 = vor.u32 %v3970_v32, %v2985_v31 }
  0x49   :  { %1108 = vmatpush.bf16.msra.mxu2 %v3062_v60  ;;  %v216_v50 = vunpack.c.l.bf16 %v199_v43  ;;  %v3257_v38 = vld [vmem:[#allocation2 + $0x3e8] sm:$0xf]  ;;  %v3934_v43 = vld [vmem:[#allocation2 + $0xb4] sm:$0xf0] }
  0x4a   :  { %1121 = vmatpush.bf16.msra.mxu3 %v3190_v63  ;;  %v209_v48 = vpack.i.b16 %v195_v42, %v195_v42  ;;  %v218_v63 = vunpack.c.l.bf16 %v207_v54  ;;  %v2841_v42 = vld [vmem:[#allocation2 + $0xa8] sm:$0xf] }
  0x4b   :  { %1083 = vmatpush.bf16.msra.mxu0 %v2790_v53  ;;  %v2777_v33 = vld [vmem:[#allocation2 + $0x28] sm:$0xf] }
  0x4c   :  { %1096 = vmatpush.bf16.msra.mxu1 %v2918_v56  ;;  %v211_v55 = vperm.slane %v209_v48, 0 }
  0x4d   :  { %1109 = vmatpush.bf16.msra.mxu2 %v3046_v11  ;;  %v2873_v11 = vld [vmem:[#allocation2 + $0xe8] sm:$0xf] }
  0x4e   :  { %1122 = vmatpush.bf16.msra.mxu3 %v3174_v15  ;;  %v219_v0 = vunpack.c.l.bf16 %v211_v55  ;;  %v3001_v15 = vld [vmem:[#allocation2 + $0x1e8] sm:$0xf]  ;;  %v2874_v23 = vor.u32 %v3942_v14, %v2873_v11  ;;  %v3994_v14 = vld [vmem:[#allocation2 + $0x294] sm:$0xf0] }
  0x4f   :  { %1084 = vmatpush.bf16.msra.mxu0 %v2774_v3  ;;  %v3002_v24 = vor.u32 %v3974_v16, %v3001_v15  ;;  %v3209_v15 = vld [vmem:[#allocation2 + $0x388] sm:$0xf]  ;;  %v4026_v16 = vld [vmem:[#allocation2 + $0x394] sm:$0xf0] }
  0x50   :  { %1097 = vmatpush.bf16.msra.mxu1 %v2902_v5 }
  0x51   :  { %1110 = vmatpush.bf16.msra.mxu2 %v3030_v29 }
  0x52   :  { %1123 = vmatpush.bf16.msra.mxu3 %v3158_v30 }
  0x53   :  { %1085 = vmatpush.bf16.msra.mxu0 %v2758_v19 }
  0x54   :  { %1098 = vmatpush.bf16.msra.mxu1 %v2886_v21 }
  0x55   :  { %1111 = vmatpush.bf16.msra.mxu2 %v3014_v36 }
  0x56   :  { %1124 = vmatpush.bf16.msra.mxu3 %v3142_v40  ;;  %v2858_v40 = vor.u32 %v3938_v26, %v2857_v25  ;;  %v3065_v25 = vld [vmem:[#allocation2 + $0x268] sm:$0xf]  ;;  %v3990_v26 = vld [vmem:[#allocation2 + $0x274] sm:$0xf0] }
  0x93   :  { %v129_v45 = vpop.f32.mrf.mxu0 }
  0x94   :  { %v142_v46 = vpop.f32.mrf.mxu1 }
  0x95   :  { %v172_v49 = vpack.c.bf16 %v142_v46, %v129_v45  ;;  %v2969_v45 = vld [vmem:[#allocation2 + $0x1a8] sm:$0xf]  ;;  %v3966_v46 = vld [vmem:[#allocation2 + $0x1b4] sm:$0xf0] }
  0x97   :  { %v212_v52 = vunpack.c.l.bf16 %v172_v49  ;;  %v213_v53 = vunpack.c.h.bf16 %v172_v49  ;;  %v3130_v49 = vor.u32 %v4006_v37, %v3129_v35  ;;  %v2905_v35 = vld [vmem:[#allocation2 + $0x128] sm:$0xf]  ;;  %v3066_v37 = vor.u32 %v3990_v26, %v3065_v25  ;;  %v4000_v25 = vld [vmem:[#allocation2 + $0x2cc] sm:$0xf]  ;;  %v3115_v26 = vld [vmem:[#allocation2 + $0x2d8] sm:$0xf0] }
  0x99   :  { %v220_v56 = vadd.f32 %v216_v50, %v212_v52  ;;  %v221_v57 = vadd.f32 %v217_v51, %v213_v53  ;;  %v3258_v50 = vor.u32 %v4038_v39, %v3257_v38  ;;  %v2842_v51 = vor.u32 %v3934_v43, %v2841_v42  ;;  %v3113_v52 = vld [vmem:[#allocation2 + $0x2c8] sm:$0xf]  ;;  %v4002_v53 = vld [vmem:[#allocation2 + $0x2d4] sm:$0xf0] }
  0x9a   :  { %v3049_v39 = vld [vmem:[#allocation2 + $0x248] sm:$0xf]  ;;  %v4018_v42 = vld [vmem:[#allocation2 + $0x354] sm:$0xf0]  ;;  %v2778_v43 = vor.u32 %v3918_v34, %v2777_v33  ;;  %v3928_v33 = vld [vmem:[#allocation2 + $0x8c] sm:$0xf] }
  0x9b   :  { %v155_v58 = vpop.f32.mrf.mxu2  ;;  %v224_v59 = vpack.c.bf16 %v221_v57, %v220_v56  ;;  %v131_v61 = vpop.f32.mrf.mxu0  ;;  %v2970_v56 = vor.u32 %v3966_v46, %v2969_v45  ;;  %v3241_v57 = vld [vmem:[#allocation2 + $0x3c8] sm:$0xf]  ;;  %v3914_v46 = vld [vmem:[#allocation2 + $0x14] sm:$0xf0]  ;;  %v2827_v34 = vld [vmem:[#allocation2 + $0x98] sm:$0xf0] }
  0x9c   :  { %v168_v60 = vpop.f32.mrf.mxu3  ;;  %v144_v1 = vpop.f32.mrf.mxu1  ;;  %v2953_v61 = vld [vmem:[#allocation2 + $0x188] sm:$0xf] }
  0x9d   :  { %v173_v62 = vpack.c.bf16 %v168_v60, %v155_v58  ;;  %v226_v2 = vunpack.c.l.bf16 %v224_v59  ;;  %v227_v3 = vunpack.c.h.bf16 %v224_v59  ;;  %v4034_v58 = vld [vmem:[#allocation2 + $0x3d4] sm:$0xf0]  ;;  %v3097_v1 = vld [vmem:[#allocation2 + $0x2a8] sm:$0xf] }
  0x9e   :  { %v3930_v60 = vld [vmem:[#allocation2 + $0x94] sm:$0xf0]  ;;  %v2761_v45 = vld [vmem:[#allocation2 + $0x8] sm:$0xf] }
  0x9f   :  { %v214_v4 = vunpack.c.l.bf16 %v173_v62  ;;  %v215_v5 = vunpack.c.h.bf16 %v173_v62  ;;  %v234_v6 = vmul.f32 0.100097656, %v226_v2  ;;  %v235_v7 = vmul.f32 0.100097656, %v227_v3  ;;  %v3962_v62 = vld [vmem:[#allocation2 + $0x194] sm:$0xf0] }
  0xa0   :  { %vm230_vm1 = vcmp.gt.f32.partialorder %v226_v2, 0.0  ;;  %vm231_vm2 = vcmp.gt.f32.partialorder %v227_v3, 0.0  ;;  %v2954_v3 = vor.u32 %v3962_v62, %v2953_v61  ;;  %v2762_v61 = vor.u32 %v3914_v46, %v2761_v45  ;;  %v3924_v45 = vld [vmem:[#allocation2 + $0x6c] sm:$0xf]  ;;  %v2811_v46 = vld [vmem:[#allocation2 + $0x78] sm:$0xf0] }
  0xa1   :  { %v222_v8 = vadd.f32 %v218_v63, %v214_v4  ;;  %v223_v9 = vadd.f32 %v219_v0, %v215_v5  ;;  %vm240_vm3 = vmpackc.low %vm231_vm2, %vm230_vm1  ;;  %v238_v10 = vpack.c.bf16 %v235_v7, %v234_v6  ;;  %v3114_v63 = vor.u32 %v4002_v53, %v3113_v52  ;;  %v3998_v4 = vld [vmem:[#allocation2 + $0x2b4] sm:$0xf0]  ;;  %v3225_v5 = vld [vmem:[#allocation2 + $0x3a8] sm:$0xf] }
  0xa2   :  { %v3242_v0 = vor.u32 %v4034_v58, %v3241_v57  ;;  %v4030_v6 = vld [vmem:[#allocation2 + $0x3b4] sm:$0xf0]  ;;  %v2809_v7 = vld [vmem:[#allocation2 + $0x68] sm:$0xf]  ;;  %v3098_v11 = vor.u32 %v3998_v4, %v3097_v1  ;;  %v3972_v53 = vld [vmem:[#allocation2 + $0x1ec] sm:$0xf] }
  0xa3   :  { %v225_v12 = vpack.c.bf16 %v223_v9, %v222_v8  ;;  %v157_v13 = vpop.f32.mrf.mxu2  ;;  %v242_v18 = vsel %vm240_vm3, %v224_v59, %v238_v10  ;;  %v2825_v59 = vld [vmem:[#allocation2 + $0x88] sm:$0xf]  ;;  %v3926_v8 = vld [vmem:[#allocation2 + $0x74] sm:$0xf0]  ;;  %v3936_v1 = vld [vmem:[#allocation2 + $0xcc] sm:$0xf] }
  0xa4   :  { %v170_v17 = vpop.f32.mrf.mxu3  ;;  %v374_v21 = vunpack.c.l.b16 %v242_v18  ;;  %v375_v22 = vunpack.c.h.b16 %v242_v18  ;;  %v2826_v2 = vor.u32 %v3930_v60, %v2825_v59  ;;  %v2937_v9 = vld [vmem:[#allocation2 + $0x168] sm:$0xf]  ;;  %v3958_v10 = vld [vmem:[#allocation2 + $0x174] sm:$0xf0]  ;;  %vm2695_vm3 = vcmask 130048  }
  0xa5   :  { %v228_v19 = vunpack.c.l.bf16 %v225_v12  ;;  %v229_v20 = vunpack.c.h.bf16 %v225_v12  ;;  %v3081_v13 = vld [vmem:[#allocation2 + $0x288] sm:$0xf]  ;;  %v2810_v17 = vor.u32 %v3926_v8, %v2809_v7  ;;  %v2938_v18 = vor.u32 %v3958_v10, %v2937_v9  ;;  %v3982_v58 = vld [vmem:[#allocation2 + $0x234] sm:$0xf0] }
  0xa6   :  { %v4410_v29 = vpack.c.b16 %v374_v21, %v374_v21  ;;  %v4412_v30 = vpack.c.b16 %v375_v22, %v375_v22  ;;  %v2921_v21 = vld [vmem:[#allocation2 + $0x148] sm:$0xf]  ;;  %v3954_v22 = vld [vmem:[#allocation2 + $0x154] sm:$0xf0] }
  0xa7   :  { %v236_v27 = vmul.f32 0.100097656, %v228_v19  ;;  %v237_v28 = vmul.f32 0.100097656, %v229_v20  ;;  %vm4414_vm4 = vcmp.gt.f32.partialorder %v228_v19, 0.0  ;;  %vm4418_vm5 = vcmp.gt.f32.partialorder %v229_v20, 0.0  ;;  %v2793_v19 = vld [vmem:[#allocation2 + $0x48] sm:$0xf] }
  0xa8   :  { %1034 = vmatmul.bf16.vlgmr.msrb.gmra.mxu0 %v4410_v29  ;;  %1047 = vmatmul.bf16.vlgmr.msrb.gmra.mxu1 %v4412_v30  ;;  %vm241_vm6 = vmpackc.low %vm4418_vm5, %vm4414_vm4  ;;  %v3922_v20 = vld [vmem:[#allocation2 + $0x54] sm:$0xf0]  ;;  %v2922_v32 = vor.u32 %v3954_v22, %v2921_v21  ;;  %v3033_v57 = vld [vmem:[#allocation2 + $0x228] sm:$0xf] }
  0xa9   :  { %v239_v36 = vpack.c.bf16 %v237_v28, %v236_v27  ;;  %1130 = vmatpush.bf16.msrb.mxu0 %v2874_v23  ;;  %1143 = vmatpush.bf16.msrb.mxu1 %v3002_v24  ;;  %v3082_v23 = vor.u32 %v3994_v14, %v3081_v13  ;;  %v3210_v24 = vor.u32 %v4026_v16, %v3209_v15  ;;  %v3193_v27 = vld [vmem:[#allocation2 + $0x368] sm:$0xf]  ;;  %v4022_v28 = vld [vmem:[#allocation2 + $0x374] sm:$0xf0]  ;;  %v4036_v13 = vld [vmem:[#allocation2 + $0x3ec] sm:$0xf] }
  0xaa   :  { %v2794_v31 = vor.u32 %v3922_v20, %v2793_v19  ;;  %v3194_v38 = vor.u32 %v4022_v28, %v3193_v27  ;;  %v3161_v59 = vld [vmem:[#allocation2 + $0x328] sm:$0xf]  ;;  %v4014_v60 = vld [vmem:[#allocation2 + $0x334] sm:$0xf0]  ;;  %v3034_v4 = vor.u32 %v3982_v58, %v3033_v57  ;;  %v3259_v14 = vld [vmem:[#allocation2 + $0x3f8] sm:$0xf0]  ;;  %v2814_v57 = vor.u32 %v3924_v45, %v2811_v46 }
  0xab   :  { %v243_v44 = vsel %vm241_vm6, %v225_v12, %v239_v36  ;;  %v3226_v12 = vor.u32 %v4030_v6, %v3225_v5  ;;  %v3950_v36 = vld [vmem:[#allocation2 + $0x134] sm:$0xf0]  ;;  %v3162_v5 = vor.u32 %v4014_v60, %v3161_v59  ;;  %v2987_v6 = vld [vmem:[#allocation2 + $0x1d8] sm:$0xf0]  ;;  %v3017_v7 = vld [vmem:[#allocation2 + $0x208] sm:$0xf] }
  0xac   :  { %v376_v47 = vunpack.c.l.b16 %v243_v44  ;;  %v377_v48 = vunpack.c.h.b16 %v243_v44  ;;  %v2906_v44 = vor.u32 %v3950_v36, %v2905_v35  ;;  %v3978_v8 = vld [vmem:[#allocation2 + $0x214] sm:$0xf0]  ;;  %v3145_v9 = vld [vmem:[#allocation2 + $0x308] sm:$0xf]  ;;  %v2843_v20 = vld [vmem:[#allocation2 + $0xb8] sm:$0xf0] }
  0xad   :  { %1131 = vmatpush.bf16.msrb.mxu0 %v2858_v40  ;;  %1144 = vmatpush.bf16.msrb.mxu1 %v2986_v41  ;;  %v3986_v40 = vld [vmem:[#allocation2 + $0x254] sm:$0xf0]  ;;  %v3177_v41 = vld [vmem:[#allocation2 + $0x348] sm:$0xf]  ;;  %v3964_v21 = vld [vmem:[#allocation2 + $0x1ac] sm:$0xf] }
  0xae   :  { %v4428_v54 = vpack.c.b16 %v376_v47, %v376_v47  ;;  %v4430_v55 = vpack.c.b16 %v377_v48, %v377_v48  ;;  %v2889_v47 = vld [vmem:[#allocation2 + $0x108] sm:$0xf]  ;;  %v3946_v48 = vld [vmem:[#allocation2 + $0x114] sm:$0xf0]  ;;  %v3178_v52 = vor.u32 %v4018_v42, %v3177_v41  ;;  %v2971_v22 = vld [vmem:[#allocation2 + $0x1b8] sm:$0xf0] }
  0xaf   :  { %v2890_v62 = vor.u32 %v3946_v48, %v2889_v47  ;;  %v4010_v10 = vld [vmem:[#allocation2 + $0x314] sm:$0xf0]  ;;  %v4032_v27 = vld [vmem:[#allocation2 + $0x3cc] sm:$0xf]  ;;  %v3243_v28 = vld [vmem:[#allocation2 + $0x3d8] sm:$0xf0] }
  0xb0   :  { %1060 = vmatmul.bf16.vlgmr.msrb.gmra.mxu2 %v4428_v54  ;;  %1073 = vmatmul.bf16.vlgmr.msrb.gmra.mxu3 %v4430_v55  ;;  %v3146_v19 = vor.u32 %v4010_v10, %v3145_v9  ;;  %v3960_v35 = vld [vmem:[#allocation2 + $0x18c] sm:$0xf]  ;;  %v2955_v36 = vld [vmem:[#allocation2 + $0x198] sm:$0xf0]  ;;  %v4097_v45 = vld [vmem:[#allocation5 + $0x1cc] sm:$0xf0] }
  0xb1   :  { %1156 = vmatpush.bf16.msrb.mxu2 %v3130_v49  ;;  %1169 = vmatpush.bf16.msrb.mxu3 %v3258_v50  ;;  %v3940_v49 = vld [vmem:[#allocation2 + $0xec] sm:$0xf]  ;;  %v2875_v50 = vld [vmem:[#allocation2 + $0xf8] sm:$0xf0] }
  0xb2   :  { %1132 = vmatpush.bf16.msrb.mxu0 %v2842_v51  ;;  %1145 = vmatpush.bf16.msrb.mxu1 %v2970_v56  ;;  %v3050_v51 = vor.u32 %v3986_v40, %v3049_v39  ;;  %v3003_v56 = vld [vmem:[#allocation2 + $0x1f8] sm:$0xf0]  ;;  %v3996_v39 = vld [vmem:[#allocation2 + $0x2ac] sm:$0xf] }
  0xb3   :  { %v3099_v40 = vld [vmem:[#allocation2 + $0x2b8] sm:$0xf0]  ;;  %v4028_v41 = vld [vmem:[#allocation2 + $0x3ac] sm:$0xf] }
  0xb4   :  { %v3227_v42 = vld [vmem:[#allocation2 + $0x3b8] sm:$0xf0]  ;;  %v3956_v47 = vld [vmem:[#allocation2 + $0x16c] sm:$0xf] }
  0xb5   :  { %1157 = vmatpush.bf16.msrb.mxu2 %v3114_v63  ;;  %1170 = vmatpush.bf16.msrb.mxu3 %v3242_v0  ;;  %v2878_v63 = vor.u32 %v3940_v49, %v2875_v50  ;;  %v3006_v0 = vor.u32 %v3972_v53, %v3003_v56  ;;  %v2939_v48 = vld [vmem:[#allocation2 + $0x178] sm:$0xf0]  ;;  %v3102_v49 = vor.u32 %v3996_v39, %v3099_v40  ;;  %v4024_v53 = vld [vmem:[#allocation2 + $0x38c] sm:$0xf]  ;;  %v3361_v40 = vld [vmem:[#allocation5 + $0xc0] sm:$0xf] }
  0xb6   :  { %1133 = vmatpush.bf16.msrb.mxu0 %v2826_v2  ;;  %1146 = vmatpush.bf16.msrb.mxu1 %v2954_v3  ;;  %v2859_v2 = vld [vmem:[#allocation2 + $0xd8] sm:$0xf0]  ;;  %v3968_v3 = vld [vmem:[#allocation2 + $0x1cc] sm:$0xf]  ;;  %v3230_v50 = vor.u32 %v4028_v41, %v3227_v42  ;;  %v2942_v58 = vor.u32 %v3956_v47, %v2939_v48 }
  0xb7   :  { %v2862_v15 = vor.u32 %v3936_v1, %v2859_v2  ;;  %v2990_v16 = vor.u32 %v3968_v3, %v2987_v6  ;;  %v3211_v56 = vld [vmem:[#allocation2 + $0x398] sm:$0xf0]  ;;  %v3920_v59 = vld [vmem:[#allocation2 + $0x4c] sm:$0xf] }
  0xb8   :  { %1086 = vmatmul.bf16.vlgmr.msra.gmra.mxu0 %v4410_v29  ;;  %1099 = vmatmul.bf16.vlgmr.msra.gmra.mxu1 %v4412_v30  ;;  %v2795_v60 = vld [vmem:[#allocation2 + $0x58] sm:$0xf0]  ;;  %v3988_v1 = vld [vmem:[#allocation2 + $0x26c] sm:$0xf] }
  0xb9   :  { %1158 = vmatpush.bf16.msrb.mxu2 %v3098_v11  ;;  %1171 = vmatpush.bf16.msrb.mxu3 %v3226_v12  ;;  %v4004_v11 = vld [vmem:[#allocation2 + $0x2ec] sm:$0xf]  ;;  %v3131_v12 = vld [vmem:[#allocation2 + $0x2f8] sm:$0xf0] }
  0xba   :  { %1134 = vmatpush.bf16.msrb.mxu0 %v2810_v17  ;;  %1147 = vmatpush.bf16.msrb.mxu1 %v2938_v18  ;;  %v3932_v17 = vld [vmem:[#allocation2 + $0xac] sm:$0xf]  ;;  %v3018_v18 = vor.u32 %v3978_v8, %v3017_v7  ;;  %v3067_v2 = vld [vmem:[#allocation2 + $0x278] sm:$0xf0] }
  0xbb   :  { %v4020_v3 = vld [vmem:[#allocation2 + $0x36c] sm:$0xf]  ;;  %v2779_v8 = vld [vmem:[#allocation2 + $0x38] sm:$0xf0] }
  0xbc   :  { %v3916_v7 = vld [vmem:[#allocation2 + $0x2c] sm:$0xf]  ;;  %v2907_v10 = vld [vmem:[#allocation2 + $0x138] sm:$0xf0] }
  0xbd   :  { %1159 = vmatpush.bf16.msrb.mxu2 %v3082_v23  ;;  %1172 = vmatpush.bf16.msrb.mxu3 %v3210_v24  ;;  %v3134_v23 = vor.u32 %v4004_v11, %v3131_v12  ;;  %v3262_v24 = vor.u32 %v4036_v13, %v3259_v14  ;;  %v3948_v9 = vld [vmem:[#allocation2 + $0x12c] sm:$0xf]  ;;  %v3070_v11 = vor.u32 %v3988_v1, %v3067_v2  ;;  %v3051_v14 = vld [vmem:[#allocation2 + $0x258] sm:$0xf0]  ;;  %v3313_v1 = vld [vmem:[#allocation5 + $0x60] sm:$0xf] }
  0xbe   :  { %1135 = vmatpush.bf16.msrb.mxu0 %v2794_v31  ;;  %1148 = vmatpush.bf16.msrb.mxu1 %v2922_v32  ;;  %v2846_v31 = vor.u32 %v3932_v17, %v2843_v20  ;;  %v2974_v32 = vor.u32 %v3964_v21, %v2971_v22  ;;  %v3984_v13 = vld [vmem:[#allocation2 + $0x24c] sm:$0xf]  ;;  %v2782_v17 = vor.u32 %v3916_v7, %v2779_v8  ;;  %v2763_v20 = vld [vmem:[#allocation2 + $0x18] sm:$0xf0]  ;;  %v4053_v2 = vld [vmem:[#allocation5 + $0x6c] sm:$0xf0] }
  0xbf   :  { %v3944_v21 = vld [vmem:[#allocation2 + $0x10c] sm:$0xf]  ;;  %v2891_v22 = vld [vmem:[#allocation2 + $0x118] sm:$0xf0]  ;;  %v3425_v7 = vld [vmem:[#allocation5 + $0x140] sm:$0xf] }
  0xc0   :  { %1112 = vmatmul.bf16.vlgmr.msra.gmra.mxu2 %v4428_v54  ;;  %1125 = vmatmul.bf16.vlgmr.msra.gmra.mxu3 %v4430_v55  ;;  %v3019_v46 = vld [vmem:[#allocation2 + $0x218] sm:$0xf0]  ;;  %v4008_v47 = vld [vmem:[#allocation2 + $0x30c] sm:$0xf] }
  0xc1   :  { %1160 = vmatpush.bf16.msrb.mxu2 %v3066_v37  ;;  %1173 = vmatpush.bf16.msrb.mxu3 %v3194_v38  ;;  %v3118_v37 = vor.u32 %v4000_v25, %v3115_v26  ;;  %v3246_v38 = vor.u32 %v4032_v27, %v3243_v28  ;;  %v3054_v25 = vor.u32 %v3984_v13, %v3051_v14  ;;  %v4069_v27 = vld [vmem:[#allocation5 + $0xec] sm:$0xf0]  ;;  %v3505_v28 = vld [vmem:[#allocation5 + $0x1e0] sm:$0xf]  ;;  %v3147_v48 = vld [vmem:[#allocation2 + $0x318] sm:$0xf0] }
  0xc2   :  { %1136 = vmatpush.bf16.msrb.mxu0 %v2778_v43  ;;  %1149 = vmatpush.bf16.msrb.mxu1 %v2906_v44  ;;  %v2830_v43 = vor.u32 %v3928_v33, %v2827_v34  ;;  %v2958_v44 = vor.u32 %v3960_v35, %v2955_v36  ;;  %v4012_v33 = vld [vmem:[#allocation2 + $0x32c] sm:$0xf]  ;;  %v3163_v34 = vld [vmem:[#allocation2 + $0x338] sm:$0xf0]  ;;  %v2894_v36 = vor.u32 %v3944_v21, %v2891_v22  ;;  %v3409_v13 = vld [vmem:[#allocation5 + $0x120] sm:$0xf] }
  0xc3   :  { %v3166_v42 = vor.u32 %v4012_v33, %v3163_v34  ;;  %v4073_v21 = vld [vmem:[#allocation5 + $0x10c] sm:$0xf0]  ;;  %v4067_v22 = vld [vmem:[#allocation5 + $0xe4] sm:$0xf] }
  0xc4   :  { %v4095_v33 = vld [vmem:[#allocation5 + $0x1c4] sm:$0xf] }
  0xc5   :  { %1161 = vmatpush.bf16.msrb.mxu2 %v3050_v51  ;;  %1174 = vmatpush.bf16.msrb.mxu3 %v3178_v52  ;;  %v3992_v51 = vld [vmem:[#allocation2 + $0x28c] sm:$0xf]  ;;  %v3083_v52 = vld [vmem:[#allocation2 + $0x298] sm:$0xf0] }
  0xc6   :  { %1137 = vmatpush.bf16.msrb.mxu0 %v2762_v61  ;;  %1150 = vmatpush.bf16.msrb.mxu1 %v2890_v62  ;;  %v3952_v61 = vld [vmem:[#allocation2 + $0x14c] sm:$0xf]  ;;  %v2923_v62 = vld [vmem:[#allocation2 + $0x158] sm:$0xf0] }
  0xc7   :  { %v2926_v6 = vor.u32 %v3952_v61, %v2923_v62  ;;  %v4057_v61 = vld [vmem:[#allocation5 + $0x8c] sm:$0xf0] }
  0xc9   :  { %1162 = vmatpush.bf16.msrb.mxu2 %v3034_v4  ;;  %1175 = vmatpush.bf16.msrb.mxu3 %v3162_v5  ;;  %v3195_v4 = vld [vmem:[#allocation2 + $0x378] sm:$0xf0]  ;;  %v2798_v5 = vor.u32 %v3920_v59, %v2795_v60  ;;  %v4093_v59 = vld [vmem:[#allocation5 + $0x1ac] sm:$0xf0]  ;;  %v3329_v60 = vld [vmem:[#allocation5 + $0x80] sm:$0xf] }
  0xca   :  { %1182 = vmatpush.bf16.msra.mxu0 %v2878_v63  ;;  %1195 = vmatpush.bf16.msra.mxu1 %v3006_v0  ;;  %v3086_v63 = vor.u32 %v3992_v51, %v3083_v52  ;;  %v3214_v0 = vor.u32 %v4024_v53, %v3211_v56  ;;  %v3198_v12 = vor.u32 %v4020_v3, %v3195_v4  ;;  %v3345_v53 = vld [vmem:[#allocation5 + $0xa0] sm:$0xf]  ;;  %v4061_v56 = vld [vmem:[#allocation5 + $0xac] sm:$0xf0] }
  0xcb   :  { %1138 = vmatmul.bf16.vlgmr.msrb.gmra.mxu0 %v4410_v29  ;;  %1151 = vmatmul.bf16.vlgmr.msrb.gmra.mxu1 %v4412_v30  ;;  %v3150_v52 = vor.u32 %v4008_v47, %v3147_v48  ;;  %v4085_v3 = vld [vmem:[#allocation5 + $0x16c] sm:$0xf0]  ;;  %v4087_v47 = vld [vmem:[#allocation5 + $0x184] sm:$0xf] }
  0xcd   :  { %1163 = vmatpush.bf16.msrb.mxu2 %v3018_v18  ;;  %1176 = vmatpush.bf16.msrb.mxu3 %v3146_v19  ;;  %v2910_v18 = vor.u32 %v3948_v9, %v2907_v10  ;;  %v3912_v19 = vld [vmem:[#allocation2 + $0xc] sm:$0xf]  ;;  %v4081_v9 = vld [vmem:[#allocation5 + $0x14c] sm:$0xf0] }
  0xce   :  { %1183 = vmatpush.bf16.msra.mxu0 %v2862_v15  ;;  %1196 = vmatpush.bf16.msra.mxu1 %v2990_v16  ;;  %v4016_v15 = vld [vmem:[#allocation2 + $0x34c] sm:$0xf]  ;;  %v3179_v16 = vld [vmem:[#allocation2 + $0x358] sm:$0xf0]  ;;  %v2766_v35 = vor.u32 %v3912_v19, %v2763_v20  ;;  %v3426_v10 = vor.u32 %v4081_v9, %v3425_v7  ;;  %v3393_v19 = vld [vmem:[#allocation5 + $0x100] sm:$0xf] }
  0xcf   :  { %v3182_v26 = vor.u32 %v4016_v15, %v3179_v16  ;;  %v4077_v15 = vld [vmem:[#allocation5 + $0x12c] sm:$0xf0]  ;;  %v4047_v7 = vld [vmem:[#allocation5 + $0x44] sm:$0xf] }
  0xd0   :  { %1164 = vmatmul.bf16.vlgmr.msrb.gmra.mxu2 %v4428_v54  ;;  %1177 = vmatmul.bf16.vlgmr.msrb.gmra.mxu3 %v4430_v55  ;;  %v3410_v16 = vor.u32 %v4077_v15, %v3409_v13 }
  0xd1   :  { %1208 = vmatpush.bf16.msra.mxu2 %v3134_v23  ;;  %1221 = vmatpush.bf16.msra.mxu3 %v3262_v24  ;;  %v3980_v23 = vld [vmem:[#allocation2 + $0x22c] sm:$0xf]  ;;  %v3377_v24 = vld [vmem:[#allocation5 + $0xe0] sm:$0xf] }
  0xd2   :  { %1184 = vmatpush.bf16.msra.mxu0 %v2846_v31  ;;  %1197 = vmatpush.bf16.msra.mxu1 %v2974_v32  ;;  %v4101_v31 = vld [vmem:[#allocation5 + $0x1ec] sm:$0xf0]  ;;  %v3035_v32 = vld [vmem:[#allocation2 + $0x238] sm:$0xf0] }
  0xd3   :  { %v3506_v39 = vor.u32 %v4101_v31, %v3505_v28  ;;  %v3038_v41 = vor.u32 %v3980_v23, %v3035_v32  ;;  %v3379_v23 = vld [vmem:[#allocation5 + $0xf0] sm:$0xf0]  ;;  %v4063_v31 = vld [vmem:[#allocation5 + $0xc4] sm:$0xf] }
  0xd4   :  { %v3363_v32 = vld [vmem:[#allocation5 + $0xd0] sm:$0xf0] }
  0xd5   :  { %1209 = vmatpush.bf16.msra.mxu2 %v3118_v37  ;;  %1222 = vmatpush.bf16.msra.mxu3 %v3246_v38  ;;  %v3976_v37 = vld [vmem:[#allocation2 + $0x20c] sm:$0xf]  ;;  %v3378_v38 = vor.u32 %v4069_v27, %v3377_v24  ;;  %v3394_v24 = vor.u32 %v4073_v21, %v3393_v19  ;;  %v3507_v27 = vld [vmem:[#allocation5 + $0x1f0] sm:$0xf0]  ;;  %v3366_v34 = vor.u32 %v4063_v31, %v3363_v32  ;;  %v4157_v21 = vld [vmem:[#allocation5 + $0x3ac] sm:$0xf0] }
  0xd6   :  { %1185 = vmatpush.bf16.msra.mxu0 %v2830_v43  ;;  %1198 = vmatpush.bf16.msra.mxu1 %v2958_v44  ;;  %v4065_v43 = vld [vmem:[#allocation5 + $0xcc] sm:$0xf0]  ;;  %v3489_v44 = vld [vmem:[#allocation5 + $0x1c0] sm:$0xf]  ;;  %v3022_v51 = vor.u32 %v3976_v37, %v3019_v46  ;;  %v4059_v37 = vld [vmem:[#allocation5 + $0xa4] sm:$0xf] }
  0xd7   :  { %v3331_v46 = vld [vmem:[#allocation5 + $0x90] sm:$0xf0] }
  0xd9   :  { %1210 = vmatpush.bf16.msra.mxu2 %v3102_v49  ;;  %1223 = vmatpush.bf16.msra.mxu3 %v3230_v50  ;;  %v3362_v49 = vor.u32 %v4065_v43, %v3361_v40  ;;  %v3490_v50 = vor.u32 %v4097_v45, %v3489_v44  ;;  %v4055_v45 = vld [vmem:[#allocation5 + $0x84] sm:$0xf] }
  0xda   :  { %1186 = vmatpush.bf16.msra.mxu0 %v2814_v57  ;;  %1199 = vmatpush.bf16.msra.mxu1 %v2942_v58  ;;  %v3473_v57 = vld [vmem:[#allocation5 + $0x1a0] sm:$0xf]  ;;  %v3346_v58 = vor.u32 %v4061_v56, %v3345_v53  ;;  %v3334_v48 = vor.u32 %v4055_v45, %v3331_v46  ;;  %v4133_v53 = vld [vmem:[#allocation5 + $0x2ec] sm:$0xf0]  ;;  %v4071_v46 = vld [vmem:[#allocation5 + $0x104] sm:$0xf] }
  0xdb   :  { %v3474_v62 = vor.u32 %v4093_v59, %v3473_v57  ;;  %v3761_v56 = vld [vmem:[#allocation5 + $0x3e0] sm:$0xf]  ;;  %v4051_v59 = vld [vmem:[#allocation5 + $0x64] sm:$0xf] }
  0xdd   :  { %1211 = vmatpush.bf16.msra.mxu2 %v3086_v63  ;;  %1224 = vmatpush.bf16.msra.mxu3 %v3214_v0  ;;  %v3457_v63 = vld [vmem:[#allocation5 + $0x180] sm:$0xf] }
  0xde   :  { %1187 = vmatpush.bf16.msra.mxu0 %v2798_v5  ;;  %1200 = vmatpush.bf16.msra.mxu1 %v2926_v6  ;;  %v3297_v5 = vld [vmem:[#allocation5 + $0x40] sm:$0xf]  ;;  %v4049_v6 = vld [vmem:[#allocation5 + $0x4c] sm:$0xf0] }
  0xdf   :  { %v3298_v8 = vor.u32 %v4049_v6, %v3297_v5  ;;  %v4161_v6 = vld [vmem:[#allocation5 + $0x3cc] sm:$0xf0] }
  0xe1   :  { %1212 = vmatpush.bf16.msra.mxu2 %v3070_v11  ;;  %1225 = vmatpush.bf16.msra.mxu3 %v3198_v12  ;;  %v3281_v11 = vld [vmem:[#allocation5 + $0x20] sm:$0xf]  ;;  %v4045_v12 = vld [vmem:[#allocation5 + $0x2c] sm:$0xf0] }
  0xe2   :  { %1188 = vmatpush.bf16.msra.mxu0 %v2782_v17  ;;  %1201 = vmatpush.bf16.msra.mxu1 %v2910_v18  ;;  %v3282_v14 = vor.u32 %v4045_v12, %v3281_v11  ;;  %v3265_v17 = vld [vmem:[#allocation5] sm:$0xf]  ;;  %v4041_v18 = vld [vmem:[#allocation5 + $0xc] sm:$0xf0]  ;;  %v4079_v11 = vld [vmem:[#allocation5 + $0x144] sm:$0xf] }
  0xe3   :  { %v3266_v20 = vor.u32 %v4041_v18, %v3265_v17  ;;  %v3427_v12 = vld [vmem:[#allocation5 + $0x150] sm:$0xf0]  ;;  %v4125_v17 = vld [vmem:[#allocation5 + $0x2ac] sm:$0xf0]  ;;  %v3729_v18 = vld [vmem:[#allocation5 + $0x3a0] sm:$0xf] }
  0xe4   :  { %v3430_v13 = vor.u32 %v4079_v11, %v3427_v12  ;;  %v3665_v11 = vld [vmem:[#allocation5 + $0x320] sm:$0xf] }
  0xe5   :  { %1213 = vmatpush.bf16.msra.mxu2 %v3054_v25  ;;  %1226 = vmatpush.bf16.msra.mxu3 %v3182_v26  ;;  %v3382_v25 = vor.u32 %v4067_v22, %v3379_v23  ;;  %v4099_v26 = vld [vmem:[#allocation5 + $0x1e4] sm:$0xf]  ;;  %v3283_v23 = vld [vmem:[#allocation5 + $0x30] sm:$0xf0] }
  0xe6   :  { %1189 = vmatpush.bf16.msra.mxu0 %v2766_v35  ;;  %1202 = vmatpush.bf16.msra.mxu1 %v2894_v36  ;;  %v3510_v28 = vor.u32 %v4099_v26, %v3507_v27  ;;  %v3491_v35 = vld [vmem:[#allocation5 + $0x1d0] sm:$0xf0]  ;;  %v4043_v22 = vld [vmem:[#allocation5 + $0x24] sm:$0xf] }
  0xe7   :  { %v3494_v36 = vor.u32 %v4095_v33, %v3491_v35  ;;  %v4075_v26 = vld [vmem:[#allocation5 + $0x124] sm:$0xf]  ;;  %v3411_v27 = vld [vmem:[#allocation5 + $0x130] sm:$0xf0]  ;;  %v3585_v33 = vld [vmem:[#allocation5 + $0x280] sm:$0xf] }
  0xe8   :  { %v3713_v35 = vld [vmem:[#allocation5 + $0x380] sm:$0xf] }
  0xe9   :  { %1214 = vmatpush.bf16.msra.mxu2 %v3038_v41  ;;  %1227 = vmatpush.bf16.msra.mxu3 %v3166_v42  ;;  %v3475_v41 = vld [vmem:[#allocation5 + $0x1b0] sm:$0xf0] }
  0xea   :  { %2088 = vmatpush.bf16.msrb.mxu0 %v3378_v38  ;;  %2101 = vmatpush.bf16.msrb.mxu1 %v3506_v39  ;;  %v3347_v38 = vld [vmem:[#allocation5 + $0xb0] sm:$0xf0]  ;;  %v4091_v39 = vld [vmem:[#allocation5 + $0x1a4] sm:$0xf] }
  0xeb   :  { %1190 = vmatmul.bf16.vlgmr.msra.gmra.mxu0 %v4410_v29  ;;  %1203 = vmatmul.bf16.vlgmr.msra.gmra.mxu1 %v4412_v30  ;;  %v4089_v29 = vld [vmem:[#allocation5 + $0x18c] sm:$0xf0]  ;;  %v3330_v30 = vor.u32 %v4057_v61, %v3329_v60  ;;  %v3350_v40 = vor.u32 %v4059_v37, %v3347_v38  ;;  %v3478_v44 = vor.u32 %v4091_v39, %v3475_v41  ;;  %v3315_v60 = vld [vmem:[#allocation5 + $0x70] sm:$0xf0] }
  0xec   :  { %v3458_v0 = vor.u32 %v4089_v29, %v3457_v63  ;;  %v4083_v63 = vld [vmem:[#allocation5 + $0x164] sm:$0xf]  ;;  %v3443_v29 = vld [vmem:[#allocation5 + $0x170] sm:$0xf0]  ;;  %v4153_v39 = vld [vmem:[#allocation5 + $0x38c] sm:$0xf0] }
  0xed   :  { %1215 = vmatpush.bf16.msra.mxu2 %v3022_v51  ;;  %1228 = vmatpush.bf16.msra.mxu3 %v3150_v52  ;;  %v3633_v52 = vld [vmem:[#allocation5 + $0x2e0] sm:$0xf]  ;;  %v3267_v41 = vld [vmem:[#allocation5 + $0x10] sm:$0xf0] }
  0xee   :  { %2089 = vmatpush.bf16.msrb.mxu0 %v3362_v49  ;;  %2102 = vmatpush.bf16.msrb.mxu1 %v3490_v50  ;;  %v3459_v49 = vld [vmem:[#allocation5 + $0x190] sm:$0xf0]  ;;  %v4453_v50 = vld [vmem:[%s4648_s4] sm:$0xf]  ;;  %v3634_v57 = vor.u32 %v4133_v53, %v3633_v52  ;;  %v4117_v53 = vld [vmem:[#allocation5 + $0x26c] sm:$0xf0] }
  0xef   :  { %v3462_v51 = vor.u32 %v4087_v47, %v3459_v49  ;;  %v3395_v47 = vld [vmem:[#allocation5 + $0x110] sm:$0xf0]  ;;  %v3569_v52 = vld [vmem:[#allocation5 + $0x260] sm:$0xf] }
  0xf0   :  { %1216 = vmatmul.bf16.vlgmr.msra.gmra.mxu2 %v4428_v54  ;;  %1229 = vmatmul.bf16.vlgmr.msra.gmra.mxu3 %v4430_v55  ;;  %v3441_v54 = vld [vmem:[#allocation5 + $0x160] sm:$0xf]  ;;  %v3314_v55 = vor.u32 %v4053_v2, %v3313_v1  ;;  %v1238_v1 = vperm.slane %v4453_v50, 0  ;;  %v1239_v2 = vperm.slane %v4453_v50, 1 }
  0xf1   :  { %v3442_v4 = vor.u32 %v4085_v3, %v3441_v54  ;;  %2114 = vmatpush.bf16.msrb.mxu2 %v3634_v57  ;;  %v3446_v54 = vor.u32 %v4083_v63, %v3443_v29  ;;  %v4129_v3 = vld [vmem:[#allocation5 + $0x2cc] sm:$0xf0]  ;;  %v3553_v29 = vld [vmem:[#allocation5 + $0x240] sm:$0xf] }
  0xf2   :  { %2090 = vmatpush.bf16.msrb.mxu0 %v3346_v58  ;;  %2103 = vmatpush.bf16.msrb.mxu1 %v3474_v62  ;;  %v4165_v58 = vld [vmem:[#allocation5 + $0x3ec] sm:$0xf0]  ;;  %v3318_v62 = vor.u32 %v4051_v59, %v3315_v60  ;;  %v1246_v19 = vpack.c.bf16 %v1239_v2, %v1238_v1  ;;  %v3570_v59 = vor.u32 %v4117_v53, %v3569_v52 }
  0xf3   :  { %v3762_v61 = vor.u32 %v4165_v58, %v3761_v56  ;;  %v3697_v56 = vld [vmem:[#allocation5 + $0x360] sm:$0xf]  ;;  %v4149_v60 = vld [vmem:[#allocation5 + $0x36c] sm:$0xf0] }
  0xf4   :  { %v1251_v37 = vunpack.c.h.b16 %v1246_v19 }
  0xf5   :  { %2127 = vmatpush.bf16.msrb.mxu3 %v3762_v61  ;;  %v3698_v61 = vor.u32 %v4149_v60, %v3697_v56  ;;  %v3603_v60 = vld [vmem:[#allocation5 + $0x2b0] sm:$0xf0] }
  0xf6   :  { %2091 = vmatpush.bf16.msrb.mxu0 %v3330_v30  ;;  %2104 = vmatpush.bf16.msrb.mxu1 %v3458_v0  ;;  %v1255_v58 = vpack.c.b16 %v1251_v37, %v1251_v37 }
  0xfa   :  { %2092 = vmatpush.bf16.msrb.mxu0 %v3314_v55  ;;  %2105 = vmatpush.bf16.msrb.mxu1 %v3442_v4  ;;  %v3617_v55 = vld [vmem:[#allocation5 + $0x2c0] sm:$0xf] }
  0xfb   :  { %v3745_v4 = vld [vmem:[#allocation5 + $0x3c0] sm:$0xf]  ;;  %v3618_v5 = vor.u32 %v4129_v3, %v3617_v55  ;;  %v4145_v3 = vld [vmem:[#allocation5 + $0x34c] sm:$0xf0] }
  0xfc   :  { %v3746_v9 = vor.u32 %v4161_v6, %v3745_v4 }
  0xfd   :  { %2115 = vmatpush.bf16.msrb.mxu2 %v3618_v5 }
  0xfe   :  { %2093 = vmatpush.bf16.msrb.mxu0 %v3298_v8  ;;  %2106 = vmatpush.bf16.msrb.mxu1 %v3426_v10  ;;  %v3299_v8 = vld [vmem:[#allocation5 + $0x50] sm:$0xf0] }
  0xff   :  { %v3302_v10 = vor.u32 %v4047_v7, %v3299_v8  ;;  %2128 = vmatpush.bf16.msrb.mxu3 %v3746_v9  ;;  %v3537_v9 = vld [vmem:[#allocation5 + $0x220] sm:$0xf] }
 0x102   :  { %2094 = vmatpush.bf16.msrb.mxu0 %v3282_v14  ;;  %2107 = vmatpush.bf16.msrb.mxu1 %v3410_v16  ;;  %v3601_v16 = vld [vmem:[#allocation5 + $0x2a0] sm:$0xf] }
 0x106   :  { %2095 = vmatpush.bf16.msrb.mxu0 %v3266_v20  ;;  %2108 = vmatpush.bf16.msrb.mxu1 %v3394_v24  ;;  %v3602_v20 = vor.u32 %v4125_v17, %v3601_v16  ;;  %v3730_v24 = vor.u32 %v4157_v21, %v3729_v18  ;;  %v3521_v21 = vld [vmem:[#allocation5 + $0x200] sm:$0xf] }
 0x108   :  { %2116 = vmatpush.bf16.msrb.mxu2 %v3602_v20  ;;  %2129 = vmatpush.bf16.msrb.mxu3 %v3730_v24 }
 0x10a   :  { %2140 = vmatpush.bf16.msra.mxu0 %v3382_v25  ;;  %2153 = vmatpush.bf16.msra.mxu1 %v3510_v28  ;;  %v3286_v25 = vor.u32 %v4043_v22, %v3283_v23  ;;  %v3414_v28 = vor.u32 %v4075_v26, %v3411_v27  ;;  %v4105_v22 = vld [vmem:[#allocation5 + $0x20c] sm:$0xf0]  ;;  %v3649_v23 = vld [vmem:[#allocation5 + $0x300] sm:$0xf] }
 0x10b   :  { %v3522_v27 = vor.u32 %v4105_v22, %v3521_v21  ;;  %v3497_v22 = vld [vmem:[#allocation5 + $0x1c8] sm:$0xf] }
 0x10e   :  { %2141 = vmatpush.bf16.msra.mxu0 %v3366_v34  ;;  %2154 = vmatpush.bf16.msra.mxu1 %v3494_v36  ;;  %v4121_v34 = vld [vmem:[#allocation5 + $0x28c] sm:$0xf0]  ;;  %v1250_v36 = vunpack.c.l.b16 %v1246_v19 }
 0x10f   :  { %v3586_v38 = vor.u32 %v4121_v34, %v3585_v33 }
 0x110   :  { %v1254_v57 = vpack.c.b16 %v1250_v36, %v1250_v36 }
 0x111   :  { %2117 = vmatpush.bf16.msrb.mxu2 %v3586_v38 }
 0x112   :  { %2142 = vmatpush.bf16.msra.mxu0 %v3350_v40  ;;  %2155 = vmatpush.bf16.msra.mxu1 %v3478_v44  ;;  %v4039_v40 = vld [vmem:[#allocation5 + $0x4] sm:$0xf]  ;;  %v3714_v44 = vor.u32 %v4153_v39, %v3713_v35  ;;  %v1259_v2 = vpack.i.b16 %v1254_v57, %v1254_v57  ;;  %v3763_v35 = vld [vmem:[#allocation5 + $0x3f0] sm:$0xf0] }
 0x113   :  { %v3270_v45 = vor.u32 %v4039_v40, %v3267_v41 }
 0x114   :  { %2130 = vmatpush.bf16.msrb.mxu3 %v3714_v44 }
 0x115   :  { %2118 = vmatpush.bf16.msrb.mxu2 %v3570_v59  ;;  %v4123_v59 = vld [vmem:[#allocation5 + $0x2a4] sm:$0xf] }
 0x116   :  { %2143 = vmatpush.bf16.msra.mxu0 %v3334_v48  ;;  %2156 = vmatpush.bf16.msra.mxu1 %v3462_v51  ;;  %v3398_v48 = vor.u32 %v4071_v46, %v3395_v47  ;;  %v3619_v46 = vld [vmem:[#allocation5 + $0x2d0] sm:$0xf0]  ;;  %v4159_v47 = vld [vmem:[#allocation5 + $0x3c4] sm:$0xf] }
 0x118   :  { %2131 = vmatpush.bf16.msrb.mxu3 %v3698_v61  ;;  %v4155_v61 = vld [vmem:[#allocation5 + $0x3a4] sm:$0xf] }
 0x11a   :  { %2144 = vmatpush.bf16.msra.mxu0 %v3318_v62  ;;  %2157 = vmatpush.bf16.msra.mxu1 %v3446_v54  ;;  %v1263_v54 = vpack.i.b16 %v1255_v58, %v1255_v58 }
 0x11c   :  { %v1265_v16 = vperm.slane %v1263_v54, 0  ;;  %v4070_v54 = vld [vmem:[#allocation5 + $0xf4] sm:$0xf0] }
 0x11e   :  { %2145 = vmatpush.bf16.msra.mxu0 %v3302_v10  ;;  %2158 = vmatpush.bf16.msra.mxu1 %v3430_v13  ;;  %v4109_v10 = vld [vmem:[#allocation5 + $0x22c] sm:$0xf0]  ;;  %v1261_v13 = vperm.slane %v1259_v2, 0  ;;  %v1279_v26 = vunpack.c.l.bf16 %v1265_v16  ;;  %v3385_v2 = vld [vmem:[#allocation5 + $0xe8] sm:$0xf] }
 0x11f   :  { %v3538_v17 = vor.u32 %v4109_v10, %v3537_v9  ;;  %v4151_v9 = vld [vmem:[#allocation5 + $0x384] sm:$0xf]  ;;  %v4102_v10 = vld [vmem:[#allocation5 + $0x1f4] sm:$0xf0] }
 0x122   :  { %2146 = vmatpush.bf16.msra.mxu0 %v3286_v25  ;;  %2159 = vmatpush.bf16.msra.mxu1 %v3414_v28  ;;  %v1278_v25 = vunpack.c.l.bf16 %v1261_v13  ;;  %v4137_v28 = vld [vmem:[#allocation5 + $0x30c] sm:$0xf0] }
 0x123   :  { %v3650_v33 = vor.u32 %v4137_v28, %v3649_v23  ;;  %v4115_v23 = vld [vmem:[#allocation5 + $0x264] sm:$0xf] }
 0x125   :  { %v4446_v42 = vpop.f32.mrf.mxu0  ;;  %v4448_v43 = vpop.f32.mrf.mxu1 }
 0x126   :  { %2147 = vmatpush.bf16.msra.mxu0 %v3270_v45  ;;  %2160 = vmatpush.bf16.msra.mxu1 %v3398_v48  ;;  %v1049_v1 = vadd.f32 %v4448_v43, %v4446_v42  ;;  %v4141_v42 = vld [vmem:[#allocation5 + $0x32c] sm:$0xf0]  ;;  %v4127_v45 = vld [vmem:[#allocation5 + $0x2c4] sm:$0xf] }
 0x127   :  { %v3666_v43 = vor.u32 %v4141_v42, %v3665_v11  ;;  %v3622_v48 = vor.u32 %v4127_v45, %v3619_v46  ;;  %v4143_v45 = vld [vmem:[#allocation5 + $0x344] sm:$0xf]  ;;  %v3481_v46 = vld [vmem:[#allocation5 + $0x1a8] sm:$0xf] }
 0x12d   :  { %v1037_v30 = vpop.f32.mrf.mxu0  ;;  %v1050_v0 = vpop.f32.mrf.mxu1 }
 0x12e   :  { %v4113_v30 = vld [vmem:[#allocation5 + $0x24c] sm:$0xf0]  ;;  %v3681_v0 = vld [vmem:[#allocation5 + $0x340] sm:$0xf] }
 0x12f   :  { %v3554_v55 = vor.u32 %v4113_v30, %v3553_v29  ;;  %v3682_v4 = vor.u32 %v4145_v3, %v3681_v0  ;;  %v3321_v0 = vld [vmem:[#allocation5 + $0x68] sm:$0xf] }
 0x131   :  { %2119 = vmatpush.bf16.msrb.mxu2 %v3554_v55  ;;  %2132 = vmatpush.bf16.msrb.mxu3 %v3682_v4  ;;  %v3513_v55 = vld [vmem:[#allocation5 + $0x1e8] sm:$0xf] }
 0x132   :  { %v3514_v21 = vor.u32 %v4102_v10, %v3513_v55  ;;  %v4135_v10 = vld [vmem:[#allocation5 + $0x304] sm:$0xf] }
 0x133   :  { %v4457_v14 = vpop.f32.mrf.mxu2  ;;  %v4459_v15 = vpop.f32.mrf.mxu3 }
 0x134   :  { %v1062_v5 = vadd.f32 %v4457_v14, %v1049_v1  ;;  %v4054_v1 = vld [vmem:[#allocation5 + $0x74] sm:$0xf0] }
 0x135   :  { %v1087_v31 = vpop.f32.mrf.mxu0  ;;  %v1100_v32 = vpop.f32.mrf.mxu1  ;;  %2120 = vmatpush.bf16.msrb.mxu2 %v3538_v17  ;;  %2133 = vmatpush.bf16.msrb.mxu3 %v3666_v43  ;;  %v3369_v43 = vld [vmem:[#allocation5 + $0xc8] sm:$0xf] }
 0x136   :  { %v1101_v6 = vadd.f32 %v1100_v32, %v1087_v31  ;;  %v1075_v18 = vadd.f32 %v4459_v15, %v1062_v5  ;;  %v4131_v31 = vld [vmem:[#allocation5 + $0x2e4] sm:$0xf]  ;;  %v3635_v32 = vld [vmem:[#allocation5 + $0x2f0] sm:$0xf0] }
 0x137   :  { %v3638_v34 = vor.u32 %v4131_v31, %v3635_v32  ;;  %v4163_v15 = vld [vmem:[#allocation5 + $0x3e4] sm:$0xf]  ;;  %v3699_v32 = vld [vmem:[#allocation5 + $0x370] sm:$0xf0] }
 0x138   :  { %v3766_v38 = vor.u32 %v4163_v15, %v3763_v35  ;;  %v4147_v31 = vld [vmem:[#allocation5 + $0x364] sm:$0xf]  ;;  %v4062_v15 = vld [vmem:[#allocation5 + $0xb4] sm:$0xf0]  ;;  %v1240_v35 = vperm.slane %v4453_v50, 2 }
 0x139   :  { %2121 = vmatpush.bf16.msrb.mxu2 %v3522_v27  ;;  %2134 = vmatpush.bf16.msrb.mxu3 %v3650_v33  ;;  %v4098_v27 = vld [vmem:[#allocation5 + $0x1d4] sm:$0xf0]  ;;  %v3702_v33 = vor.u32 %v4147_v31, %v3699_v32 }
 0x13b   :  { %v1063_v49 = vpop.f32.mrf.mxu2  ;;  %v1076_v51 = vpop.f32.mrf.mxu3 }
 0x13c   :  { %v3747_v49 = vld [vmem:[#allocation5 + $0x3d0] sm:$0xf0] }
 0x13d   :  { %v1089_v62 = vpop.f32.mrf.mxu0  ;;  %v1102_v63 = vpop.f32.mrf.mxu1  ;;  %2166 = vmatpush.bf16.msra.mxu2 %v3638_v34  ;;  %2179 = vmatpush.bf16.msra.mxu3 %v3766_v38  ;;  %v3750_v52 = vor.u32 %v4159_v47, %v3747_v49  ;;  %v3353_v34 = vld [vmem:[#allocation5 + $0xa8] sm:$0xf]  ;;  %v4094_v47 = vld [vmem:[#allocation5 + $0x1b4] sm:$0xf0]  ;;  %v3683_v49 = vld [vmem:[#allocation5 + $0x350] sm:$0xf0] }
 0x13e   :  { %v3606_v62 = vor.u32 %v4123_v59, %v3603_v60  ;;  %v3731_v63 = vld [vmem:[#allocation5 + $0x3b0] sm:$0xf0]  ;;  %v4139_v60 = vld [vmem:[#allocation5 + $0x324] sm:$0xf] }
 0x13f   :  { %v3734_v3 = vor.u32 %v4155_v61, %v3731_v63  ;;  %v3539_v59 = vld [vmem:[#allocation5 + $0x230] sm:$0xf0]  ;;  %v3465_v61 = vld [vmem:[#allocation5 + $0x188] sm:$0xf] }
 0x141   :  { %2167 = vmatpush.bf16.msra.mxu2 %v3622_v48  ;;  %2180 = vmatpush.bf16.msra.mxu3 %v3750_v52  ;;  %v3337_v52 = vld [vmem:[#allocation5 + $0x88] sm:$0xf] }
 0x143   :  { %v1113_v7 = vpop.f32.mrf.mxu2  ;;  %v1126_v8 = vpop.f32.mrf.mxu3 }
 0x144   :  { %v1114_v12 = vadd.f32 %v1113_v7, %v1101_v6  ;;  %v4119_v7 = vld [vmem:[#allocation5 + $0x284] sm:$0xf] }
 0x145   :  { %2168 = vmatpush.bf16.msra.mxu2 %v3606_v62  ;;  %2181 = vmatpush.bf16.msra.mxu3 %v3734_v3  ;;  %v4090_v62 = vld [vmem:[#allocation5 + $0x194] sm:$0xf0] }
 0x146   :  { %v1127_v19 = vadd.f32 %v1126_v8, %v1114_v12  ;;  %v3587_v8 = vld [vmem:[#allocation5 + $0x290] sm:$0xf0]  ;;  %v3466_v3 = vor.u32 %v4090_v62, %v3465_v61 }
 0x147   :  { %v3590_v11 = vor.u32 %v4119_v7, %v3587_v8  ;;  %v3715_v12 = vld [vmem:[#allocation5 + $0x390] sm:$0xf0]  ;;  %v4103_v8 = vld [vmem:[#allocation5 + $0x204] sm:$0xf] }
 0x148   :  { %v4465_v20 = vpop.f32.mrf.mxu0  ;;  %v4467_v14 = vpop.f32.mrf.mxu1  ;;  %v1234_v24 = vpack.c.bf16 %v1127_v19, %v1075_v18  ;;  %v3718_v16 = vor.u32 %v4151_v9, %v3715_v12  ;;  %v4066_v18 = vld [vmem:[#allocation5 + $0xd4] sm:$0xf0]  ;;  %v3386_v19 = vor.u32 %v4070_v54, %v3385_v2  ;;  %v3523_v9 = vld [vmem:[#allocation5 + $0x210] sm:$0xf0] }
 0x149   :  { %2169 = vmatpush.bf16.msra.mxu2 %v3590_v11  ;;  %v3449_v11 = vld [vmem:[#allocation5 + $0x168] sm:$0xf]  ;;  %v4086_v12 = vld [vmem:[#allocation5 + $0x174] sm:$0xf0] }
 0x14a   :  { %v1274_v36 = vunpack.c.l.bf16 %v1234_v24  ;;  %v1275_v37 = vunpack.c.h.bf16 %v1234_v24  ;;  %v3571_v24 = vld [vmem:[#allocation5 + $0x270] sm:$0xf0]  ;;  %2182 = vmatpush.bf16.msra.mxu3 %v3718_v16 }
 0x14b   :  { %v1115_v39 = vpop.f32.mrf.mxu2  ;;  %v1128_v40 = vpop.f32.mrf.mxu3  ;;  %v3574_v28 = vor.u32 %v4115_v23, %v3571_v24  ;;  %v3651_v16 = vld [vmem:[#allocation5 + $0x310] sm:$0xf0]  ;;  %v3433_v23 = vld [vmem:[#allocation5 + $0x148] sm:$0xf]  ;;  %v4082_v24 = vld [vmem:[#allocation5 + $0x154] sm:$0xf0] }
 0x14c   :  { %v1282_v41 = vadd.f32 %v1278_v25, %v1274_v36  ;;  %v1283_v44 = vadd.f32 %v1279_v26, %v1275_v37  ;;  %v1241_v36 = vperm.slane %v4453_v50, 3  ;;  %v3370_v39 = vor.u32 %v4066_v18, %v3369_v43 }
 0x14d   :  { %v3498_v40 = vor.u32 %v4098_v27, %v3497_v22  ;;  %2170 = vmatpush.bf16.msra.mxu2 %v3574_v28  ;;  %v3354_v50 = vor.u32 %v4062_v15, %v3353_v34  ;;  %v3450_v43 = vor.u32 %v4086_v12, %v3449_v11  ;;  %v4050_v22 = vld [vmem:[#allocation5 + $0x54] sm:$0xf0]  ;;  %v3434_v34 = vor.u32 %v4082_v24, %v3433_v23  ;;  %v3289_v15 = vld [vmem:[#allocation5 + $0x28] sm:$0xf]  ;;  %v4060_v11 = vld [vmem:[#allocation5 + $0xac] sm:$0xf] }
 0x14e   :  { %v1286_v51 = vpack.c.bf16 %v1283_v44, %v1282_v41  ;;  %v4111_v41 = vld [vmem:[#allocation5 + $0x244] sm:$0xf]  ;;  %v3555_v44 = vld [vmem:[#allocation5 + $0x250] sm:$0xf0]  ;;  %2183 = vmatpush.bf16.msra.mxu3 %v3702_v33  ;;  %v3355_v12 = vld [vmem:[#allocation5 + $0xb8] sm:$0xf0] }
 0x14f   :  { %v3558_v48 = vor.u32 %v4111_v41, %v3555_v44  ;;  %v4088_v23 = vld [vmem:[#allocation5 + $0x18c] sm:$0xf]  ;;  %v3467_v24 = vld [vmem:[#allocation5 + $0x198] sm:$0xf0] }
 0x150   :  { %v1141_v53 = vpop.f32.mrf.mxu0  ;;  %v1154_v56 = vpop.f32.mrf.mxu1  ;;  %v1288_v57 = vunpack.c.l.bf16 %v1286_v51  ;;  %v1289_v58 = vunpack.c.h.bf16 %v1286_v51 }
 0x151   :  { %v4058_v53 = vld [vmem:[#allocation5 + $0x94] sm:$0xf0]  ;;  %v3482_v56 = vor.u32 %v4094_v47, %v3481_v46  ;;  %2171 = vmatpush.bf16.msra.mxu2 %v3558_v48 }
 0x152   :  { %v1296_v29 = vmul.f32 0.100097656, %v1288_v57  ;;  %v1297_v30 = vmul.f32 0.100097656, %v1289_v58  ;;  %vm4469_vm7 = vcmp.gt.f32.partialorder %v1288_v57, 0.0  ;;  %vm4473_vm8 = vcmp.gt.f32.partialorder %v1289_v58, 0.0  ;;  %v4107_v58 = vld [vmem:[#allocation5 + $0x224] sm:$0xf] }
 0x153   :  { %v4477_v4 = vpop.f32.mrf.mxu2  ;;  %v4479_v5 = vpop.f32.mrf.mxu3  ;;  %vm1302_vm9 = vmpackc.low %vm4473_vm8, %vm4469_vm7  ;;  %v1247_v57 = vpack.c.bf16 %v1241_v36, %v1240_v35  ;;  %v3542_v63 = vor.u32 %v4107_v58, %v3539_v59  ;;  %v3338_v55 = vor.u32 %v4058_v53, %v3337_v52  ;;  %v1153_v35 = vadd.f32 %v4467_v14, %v4465_v20  ;;  %v4046_v36 = vld [vmem:[#allocation5 + $0x34] sm:$0xf0]  ;;  %v3401_v53 = vld [vmem:[#allocation5 + $0x108] sm:$0xf] }
 0x154   :  { %v1300_v6 = vpack.c.bf16 %v1297_v30, %v1296_v29  ;;  %v3667_v29 = vld [vmem:[#allocation5 + $0x330] sm:$0xf0]  ;;  %v3290_v47 = vor.u32 %v4046_v36, %v3289_v15  ;;  %v4068_v20 = vld [vmem:[#allocation5 + $0xec] sm:$0xf]  ;;  %v3387_v14 = vld [vmem:[#allocation5 + $0xf8] sm:$0xf0] }
 0x155   :  { %v3670_v30 = vor.u32 %v4139_v60, %v3667_v29  ;;  %v1253_v7 = vunpack.c.h.b16 %v1247_v57  ;;  %2172 = vmatpush.bf16.msra.mxu2 %v3542_v63  ;;  %v3390_v29 = vor.u32 %v4068_v20, %v3387_v14  ;;  %v4134_v15 = vld [vmem:[#allocation5 + $0x2f4] sm:$0xf0]  ;;  %v3753_v20 = vld [vmem:[#allocation5 + $0x3c8] sm:$0xf] }
 0x156   :  { %v1304_v13 = vsel %vm1302_vm9, %v1286_v51, %v1300_v6  ;;  %v3686_v51 = vor.u32 %v4143_v45, %v3683_v49  ;;  %v1252_v6 = vunpack.c.l.b16 %v1247_v57  ;;  %v3273_v49 = vld [vmem:[#allocation5 + $0x8] sm:$0xf]  ;;  %v3515_v57 = vld [vmem:[#allocation5 + $0x1f8] sm:$0xf0]  ;;  %v4166_v36 = vld [vmem:[#allocation5 + $0x3f4] sm:$0xf0] }
 0x157   :  { %v1436_v17 = vunpack.c.l.b16 %v1304_v13  ;;  %v1437_v42 = vunpack.c.h.b16 %v1304_v13  ;;  %v3526_v13 = vor.u32 %v4103_v8, %v3523_v9  ;;  %v4162_v14 = vld [vmem:[#allocation5 + $0x3d4] sm:$0xf0] }
 0x158   :  { %2184 = vmatpush.bf16.msra.mxu3 %v3686_v51  ;;  %v1256_v18 = vpack.c.b16 %v1252_v6, %v1252_v6  ;;  %v4042_v51 = vld [vmem:[#allocation5 + $0x14] sm:$0xf0] }
 0x159   :  { %v4485_v25 = vpack.c.b16 %v1436_v17, %v1436_v17  ;;  %v4487_v26 = vpack.c.b16 %v1437_v42, %v1437_v42  ;;  %v3654_v17 = vor.u32 %v4135_v10, %v3651_v16  ;;  %v3322_v42 = vor.u32 %v4054_v1, %v3321_v0  ;;  %2173 = vmatpush.bf16.msra.mxu2 %v3526_v13  ;;  %v4064_v0 = vld [vmem:[#allocation5 + $0xcc] sm:$0xf]  ;;  %v3371_v1 = vld [vmem:[#allocation5 + $0xd8] sm:$0xf0] }
 0x15a   :  { %v1267_v32 = vpack.i.b16 %v1256_v18, %v1256_v18  ;;  %v3274_v60 = vor.u32 %v4042_v51, %v3273_v49  ;;  %v4092_v13 = vld [vmem:[#allocation5 + $0x1ac] sm:$0xf]  ;;  %v3483_v16 = vld [vmem:[#allocation5 + $0x1b8] sm:$0xf0]  ;;  %v3358_v18 = vor.u32 %v4060_v11, %v3355_v12  ;;  %v4130_v49 = vld [vmem:[#allocation5 + $0x2d4] sm:$0xf0] }
 0x15b   :  { %2096 = vmatmul.bf16.vlgmr.msrb.gmra.mxu0 %v4485_v25  ;;  %2109 = vmatmul.bf16.vlgmr.msrb.gmra.mxu1 %v4487_v26  ;;  %v1167_v37 = vpop.f32.mrf.mxu2  ;;  %v1180_v38 = vpop.f32.mrf.mxu3  ;;  %v4154_v11 = vld [vmem:[#allocation5 + $0x394] sm:$0xf0]  ;;  %v4040_v12 = vld [vmem:[#allocation5 + $0xc] sm:$0xf] }
 0x15c   :  { %2192 = vmatpush.bf16.msrb.mxu0 %v3386_v19  ;;  %2205 = vmatpush.bf16.msrb.mxu1 %v3514_v21  ;;  %v1257_v19 = vpack.c.b16 %v1253_v7, %v1253_v7  ;;  %v3305_v21 = vld [vmem:[#allocation5 + $0x48] sm:$0xf]  ;;  %v4078_v38 = vld [vmem:[#allocation5 + $0x134] sm:$0xf0]  ;;  %v1269_v45 = vperm.slane %v1267_v32, 0  ;;  %v3470_v32 = vor.u32 %v4088_v23, %v3467_v24 }
 0x15d   :  { %2185 = vmatpush.bf16.msra.mxu3 %v3670_v30  ;;  %v3306_v27 = vor.u32 %v4050_v22, %v3305_v21  ;;  %v3417_v37 = vld [vmem:[#allocation5 + $0x128] sm:$0xf]  ;;  %v4056_v21 = vld [vmem:[#allocation5 + $0x8c] sm:$0xf]  ;;  %v3339_v22 = vld [vmem:[#allocation5 + $0x98] sm:$0xf0] }
 0x15e   :  { %v1271_v33 = vpack.i.b16 %v1257_v19, %v1257_v19  ;;  %v3418_v48 = vor.u32 %v4078_v38, %v3417_v37  ;;  %v1280_v59 = vunpack.c.l.bf16 %v1269_v45  ;;  %v3486_v19 = vor.u32 %v4092_v13, %v3483_v16  ;;  %v4052_v37 = vld [vmem:[#allocation5 + $0x6c] sm:$0xf]  ;;  %v3275_v13 = vld [vmem:[#allocation5 + $0x18] sm:$0xf0]  ;;  %v3705_v23 = vld [vmem:[#allocation5 + $0x368] sm:$0xf] }
 0x15f   :  { %v4072_v16 = vld [vmem:[#allocation5 + $0x10c] sm:$0xf]  ;;  %v4150_v24 = vld [vmem:[#allocation5 + $0x374] sm:$0xf0] }
 0x160   :  { %2193 = vmatpush.bf16.msrb.mxu0 %v3370_v39  ;;  %2206 = vmatpush.bf16.msrb.mxu1 %v3498_v40  ;;  %v1166_v39 = vadd.f32 %v4477_v4, %v1153_v35  ;;  %v1273_v46 = vperm.slane %v1271_v33, 0  ;;  %v3769_v35 = vld [vmem:[#allocation5 + $0x3e8] sm:$0xf] }
 0x161   :  { %2186 = vmatpush.bf16.msra.mxu3 %v3654_v17 }
 0x162   :  { %v1179_v4 = vadd.f32 %v4479_v5, %v1166_v39  ;;  %v1281_v63 = vunpack.c.l.bf16 %v1273_v46  ;;  %v3374_v5 = vor.u32 %v4064_v0, %v3371_v1  ;;  %v3323_v39 = vld [vmem:[#allocation5 + $0x78] sm:$0xf0]  ;;  %v4158_v0 = vld [vmem:[#allocation5 + $0x3b4] sm:$0xf0]  ;;  %v4044_v1 = vld [vmem:[#allocation5 + $0x2c] sm:$0xf] }
 0x164   :  { %2194 = vmatpush.bf16.msrb.mxu0 %v3354_v50  ;;  %2207 = vmatpush.bf16.msrb.mxu1 %v3482_v56  ;;  %v4074_v50 = vld [vmem:[#allocation5 + $0x114] sm:$0xf0]  ;;  %v4100_v56 = vld [vmem:[#allocation5 + $0x1ec] sm:$0xf] }
 0x165   :  { %v3402_v61 = vor.u32 %v4074_v50, %v3401_v53  ;;  %v3518_v30 = vor.u32 %v4100_v56, %v3515_v57  ;;  %v3326_v53 = vor.u32 %v4052_v37, %v3323_v39  ;;  %v4048_v56 = vld [vmem:[#allocation5 + $0x4c] sm:$0xf]  ;;  %v3307_v57 = vld [vmem:[#allocation5 + $0x58] sm:$0xf0]  ;;  %v4110_v37 = vld [vmem:[#allocation5 + $0x234] sm:$0xf0] }
 0x166   :  { %v4142_v39 = vld [vmem:[#allocation5 + $0x334] sm:$0xf0] }
 0x168   :  { %v1191_v2 = vpop.f32.mrf.mxu0  ;;  %v1204_v54 = vpop.f32.mrf.mxu1  ;;  %2195 = vmatpush.bf16.msrb.mxu0 %v3338_v55  ;;  %2208 = vmatpush.bf16.msrb.mxu1 %v3466_v3 }
 0x169   :  { %v1205_v40 = vadd.f32 %v1204_v54, %v1191_v2  ;;  %v4096_v2 = vld [vmem:[#allocation5 + $0x1cc] sm:$0xf]  ;;  %v3499_v54 = vld [vmem:[#allocation5 + $0x1d8] sm:$0xf0] }
 0x16a   :  { %v3502_v10 = vor.u32 %v4096_v2, %v3499_v54  ;;  %v3291_v2 = vld [vmem:[#allocation5 + $0x38] sm:$0xf0]  ;;  %v4076_v54 = vld [vmem:[#allocation5 + $0x12c] sm:$0xf] }
 0x16b   :  { %2148 = vmatmul.bf16.vlgmr.msra.gmra.mxu0 %v4485_v25  ;;  %2161 = vmatmul.bf16.vlgmr.msra.gmra.mxu1 %v4487_v26 }
 0x16c   :  { %2196 = vmatpush.bf16.msrb.mxu0 %v3322_v42  ;;  %2209 = vmatpush.bf16.msrb.mxu1 %v3450_v43 }
 0x170   :  { %v1193_v28 = vpop.f32.mrf.mxu0  ;;  %v1206_v31 = vpop.f32.mrf.mxu1  ;;  %2197 = vmatpush.bf16.msrb.mxu0 %v3306_v27  ;;  %2210 = vmatpush.bf16.msrb.mxu1 %v3434_v34  ;;  %v3641_v34 = vld [vmem:[#allocation5 + $0x2e8] sm:$0xf] }
 0x171   :  { %v3342_v31 = vor.u32 %v4056_v21, %v3339_v22  ;;  %v3642_v46 = vor.u32 %v4134_v15, %v3641_v34  ;;  %v4118_v22 = vld [vmem:[#allocation5 + $0x274] sm:$0xf0] }
 0x172   :  { %v4146_v34 = vld [vmem:[#allocation5 + $0x354] sm:$0xf0] }
 0x173   :  { %v1217_v41 = vpop.f32.mrf.mxu2  ;;  %v1230_v44 = vpop.f32.mrf.mxu3 }
 0x174   :  { %v1218_v52 = vadd.f32 %v1217_v41, %v1205_v40  ;;  %2198 = vmatpush.bf16.msrb.mxu0 %v3290_v47  ;;  %2211 = vmatpush.bf16.msrb.mxu1 %v3418_v48  ;;  %v4084_v40 = vld [vmem:[#allocation5 + $0x16c] sm:$0xf]  ;;  %v3451_v41 = vld [vmem:[#allocation5 + $0x178] sm:$0xf0]  ;;  %v3770_v47 = vor.u32 %v4166_v36, %v3769_v35  ;;  %v3625_v48 = vld [vmem:[#allocation5 + $0x2c8] sm:$0xf] }
 0x175   :  { %v3454_v50 = vor.u32 %v4084_v40, %v3451_v41  ;;  %v3545_v36 = vld [vmem:[#allocation5 + $0x228] sm:$0xf] }
 0x176   :  { %v1231_v58 = vadd.f32 %v1230_v44, %v1218_v52  ;;  %v3546_v40 = vor.u32 %v4110_v37, %v3545_v36 }
 0x178   :  { %v1235_v62 = vpack.c.bf16 %v1231_v58, %v1179_v4  ;;  %2199 = vmatpush.bf16.msrb.mxu0 %v3274_v60  ;;  %2212 = vmatpush.bf16.msrb.mxu1 %v3402_v61  ;;  %v4080_v4 = vld [vmem:[#allocation5 + $0x14c] sm:$0xf]  ;;  %v3435_v58 = vld [vmem:[#allocation5 + $0x158] sm:$0xf0]  ;;  %v3754_v60 = vor.u32 %v4162_v14, %v3753_v20  ;;  %v3609_v61 = vld [vmem:[#allocation5 + $0x2a8] sm:$0xf] }
 0x17a   :  { %v1276_v55 = vunpack.c.l.bf16 %v1235_v62  ;;  %v1277_v3 = vunpack.c.h.bf16 %v1235_v62  ;;  %v4126_v62 = vld [vmem:[#allocation5 + $0x2b4] sm:$0xf0] }
 0x17b   :  { %v1219_v6 = vpop.f32.mrf.mxu2  ;;  %v1232_v7 = vpop.f32.mrf.mxu3  ;;  %2200 = vmatmul.bf16.vlgmr.msrb.gmra.mxu0 %v4485_v25  ;;  %2213 = vmatmul.bf16.vlgmr.msrb.gmra.mxu1 %v4487_v26 }
 0x17c   :  { %v1284_v8 = vadd.f32 %v1280_v59, %v1276_v55  ;;  %v1285_v9 = vadd.f32 %v1281_v63, %v1277_v3  ;;  %2244 = vmatpush.bf16.msra.mxu0 %v3390_v29  ;;  %2257 = vmatpush.bf16.msra.mxu1 %v3518_v30  ;;  %v3626_v59 = vor.u32 %v4130_v49, %v3625_v48  ;;  %v3737_v30 = vld [vmem:[#allocation5 + $0x3a8] sm:$0xf]  ;;  %v3419_v55 = vld [vmem:[#allocation5 + $0x138] sm:$0xf0]  ;;  %v4132_v48 = vld [vmem:[#allocation5 + $0x2ec] sm:$0xf] }
 0x17d   :  { %v3310_v63 = vor.u32 %v4048_v56, %v3307_v57  ;;  %v3438_v29 = vor.u32 %v4080_v4, %v3435_v58  ;;  %v3610_v3 = vor.u32 %v4126_v62, %v3609_v61  ;;  %v3738_v6 = vor.u32 %v4158_v0, %v3737_v30  ;;  %v3593_v7 = vld [vmem:[#allocation5 + $0x288] sm:$0xf]  ;;  %v3643_v49 = vld [vmem:[#allocation5 + $0x2f8] sm:$0xf0]  ;;  %v4128_v56 = vld [vmem:[#allocation5 + $0x2cc] sm:$0xf] }
 0x17e   :  { %v1287_v17 = vpack.c.bf16 %v1285_v9, %v1284_v8  ;;  %v3294_v8 = vor.u32 %v4044_v1, %v3291_v2  ;;  %v3422_v9 = vor.u32 %v4076_v54, %v3419_v55  ;;  %v3627_v57 = vld [vmem:[#allocation5 + $0x2d8] sm:$0xf0]  ;;  %v4160_v4 = vld [vmem:[#allocation5 + $0x3cc] sm:$0xf] }
 0x17f   :  { %v3755_v58 = vld [vmem:[#allocation5 + $0x3d8] sm:$0xf0]  ;;  %v4124_v61 = vld [vmem:[#allocation5 + $0x2ac] sm:$0xf] }
 0x180   :  { %v1290_v42 = vunpack.c.l.bf16 %v1287_v17  ;;  %v1291_v43 = vunpack.c.h.bf16 %v1287_v17  ;;  %2245 = vmatpush.bf16.msra.mxu0 %v3374_v5  ;;  %2258 = vmatpush.bf16.msra.mxu1 %v3502_v10  ;;  %v4122_v5 = vld [vmem:[#allocation5 + $0x294] sm:$0xf0]  ;;  %v3721_v10 = vld [vmem:[#allocation5 + $0x388] sm:$0xf]  ;;  %v3611_v62 = vld [vmem:[#allocation5 + $0x2b8] sm:$0xf0] }
 0x181   :  { %v3614_v30 = vor.u32 %v4124_v61, %v3611_v62  ;;  %v4120_v1 = vld [vmem:[#allocation5 + $0x28c] sm:$0xf]  ;;  %v3595_v2 = vld [vmem:[#allocation5 + $0x298] sm:$0xf0]  ;;  %v4177_v61 = vld [vmem:[%s4651_s7 + $0x50] sm:$0xff] }
 0x182   :  { %v1298_v27 = vmul.f32 0.100097656, %v1290_v42  ;;  %v1299_v28 = vmul.f32 0.100097656, %v1291_v43  ;;  %vm1294_vm10 = vcmp.gt.f32.partialorder %v1290_v42, 0.0  ;;  %vm1295_vm11 = vcmp.gt.f32.partialorder %v1291_v43, 0.0  ;;  %v4152_v54 = vld [vmem:[#allocation5 + $0x38c] sm:$0xf] }
 0x183   :  { %vm1303_vm12 = vmpackc.low %vm1295_vm11, %vm1294_vm10  ;;  %v3594_v42 = vor.u32 %v4122_v5, %v3593_v7  ;;  %v3722_v43 = vor.u32 %v4154_v11, %v3721_v10  ;;  %v3723_v55 = vld [vmem:[#allocation5 + $0x398] sm:$0xf0]  ;;  %v4116_v7 = vld [vmem:[#allocation5 + $0x26c] sm:$0xf] }
 0x184   :  { %2246 = vmatpush.bf16.msra.mxu0 %v3358_v18  ;;  %2259 = vmatpush.bf16.msra.mxu1 %v3486_v19  ;;  %v1301_v33 = vpack.c.bf16 %v1299_v28, %v1298_v27  ;;  %v3577_v18 = vld [vmem:[#allocation5 + $0x268] sm:$0xf]  ;;  %v3278_v19 = vor.u32 %v4040_v12, %v3275_v13  ;;  %v3706_v28 = vor.u32 %v4150_v24, %v3705_v23  ;;  %v3579_v5 = vld [vmem:[#allocation5 + $0x278] sm:$0xf0]  ;;  %v4112_v12 = vld [vmem:[#allocation5 + $0x24c] sm:$0xf] }
 0x185   :  { %v3578_v27 = vor.u32 %v4118_v22, %v3577_v18  ;;  %v3582_v10 = vor.u32 %v4116_v7, %v3579_v5  ;;  %v3563_v13 = vld [vmem:[#allocation5 + $0x258] sm:$0xf0]  ;;  %v4108_v18 = vld [vmem:[#allocation5 + $0x22c] sm:$0xf] }
 0x186   :  { %v1305_v38 = vsel %vm1303_vm12, %v1287_v17, %v1301_v33  ;;  %v3403_v17 = vld [vmem:[#allocation5 + $0x118] sm:$0xf0]  ;;  %v3689_v33 = vld [vmem:[#allocation5 + $0x348] sm:$0xf] }
 0x187   :  { %v1438_v44 = vunpack.c.l.b16 %v1305_v38  ;;  %v1439_v45 = vunpack.c.h.b16 %v1305_v38  ;;  %v3406_v21 = vor.u32 %v4072_v16, %v3403_v17  ;;  %v3690_v35 = vor.u32 %v4146_v34, %v3689_v33  ;;  %v3673_v38 = vld [vmem:[#allocation5 + $0x328] sm:$0xf]  ;;  %v4144_v16 = vld [vmem:[#allocation5 + $0x34c] sm:$0xf]  ;;  %v3691_v17 = vld [vmem:[#allocation5 + $0x358] sm:$0xf0] }
 0x188   :  { %2247 = vmatpush.bf16.msra.mxu0 %v3342_v31  ;;  %2260 = vmatpush.bf16.msra.mxu1 %v3470_v32  ;;  %v3561_v31 = vld [vmem:[#allocation5 + $0x248] sm:$0xf]  ;;  %v4114_v32 = vld [vmem:[#allocation5 + $0x254] sm:$0xf0]  ;;  %v3674_v41 = vor.u32 %v4142_v39, %v3673_v38  ;;  %v3675_v22 = vld [vmem:[#allocation5 + $0x338] sm:$0xf0] }
 0x189   :  { %v4501_v51 = vpack.c.b16 %v1438_v44, %v1438_v44  ;;  %v4503_v52 = vpack.c.b16 %v1439_v45, %v1439_v45  ;;  %v3562_v15 = vor.u32 %v4114_v32, %v3561_v31  ;;  %v3529_v44 = vld [vmem:[#allocation5 + $0x208] sm:$0xf]  ;;  %v4106_v45 = vld [vmem:[#allocation5 + $0x214] sm:$0xf0]  ;;  %v4136_v31 = vld [vmem:[#allocation5 + $0x30c] sm:$0xf] }
 0x18a   :  { %v3659_v32 = vld [vmem:[#allocation5 + $0x318] sm:$0xf0] }
 0x18b   :  { %2122 = vmatmul.bf16.vlgmr.msrb.gmra.mxu2 %v4501_v51  ;;  %2135 = vmatmul.bf16.vlgmr.msrb.gmra.mxu3 %v4503_v52  ;;  %v3662_v34 = vor.u32 %v4136_v31, %v3659_v32  ;;  %v4190_v7 = vld [vmem:[%s4651_s7 + $0xb8] sm:$0xff] }
 0x18c   :  { %2218 = vmatpush.bf16.msrb.mxu2 %v3642_v46  ;;  %2231 = vmatpush.bf16.msrb.mxu3 %v3770_v47  ;;  %v3657_v46 = vld [vmem:[#allocation5 + $0x308] sm:$0xf]  ;;  %v4138_v47 = vld [vmem:[#allocation5 + $0x314] sm:$0xf0] }
 0x18d   :  { %2248 = vmatpush.bf16.msra.mxu0 %v3326_v53  ;;  %2261 = vmatpush.bf16.msra.mxu1 %v3454_v50  ;;  %v4164_v53 = vld [vmem:[#allocation5 + $0x3ec] sm:$0xf]  ;;  %v3771_v50 = vld [vmem:[#allocation5 + $0x3f8] sm:$0xf0]  ;;  %v3658_v20 = vor.u32 %v4138_v47, %v3657_v46  ;;  %v4173_v47 = vld [vmem:[%s4651_s7 + $0x30] sm:$0xff] }
 0x18e   :  { %v3774_v14 = vor.u32 %v4164_v53, %v3771_v50  ;;  %v4172_v53 = vld [vmem:[%s4651_s7 + $0x28] sm:$0xff]  ;;  %v4198_v5 = vld [vmem:[%s4651_s7 + $0xf8] sm:$0xff] }
 0x18f   :  { %v4180_v50 = vld [vmem:[%s4651_s7 + $0x68] sm:$0xff] }
 0x190   :  { %2219 = vmatpush.bf16.msrb.mxu2 %v3626_v59  ;;  %2232 = vmatpush.bf16.msrb.mxu3 %v3754_v60  ;;  %v3630_v59 = vor.u32 %v4128_v56, %v3627_v57  ;;  %v3758_v60 = vor.u32 %v4160_v4, %v3755_v58  ;;  %v4170_v56 = vld [vmem:[%s4651_s7 + $0x18] sm:$0xff]  ;;  %v4556_v4 = vld [vmem:[%s4650_s6] sm:$0xf] }
 0x191   :  { %2249 = vmatpush.bf16.msra.mxu0 %v3310_v63  ;;  %2262 = vmatpush.bf16.msra.mxu1 %v3438_v29  ;;  %v4156_v63 = vld [vmem:[#allocation5 + $0x3ac] sm:$0xf]  ;;  %v3739_v29 = vld [vmem:[#allocation5 + $0x3b8] sm:$0xf0]  ;;  %v2300_v58 = vperm.slane %v4556_v4, 0 }
 0x192   :  { %v3742_v0 = vor.u32 %v4156_v63, %v3739_v29  ;;  %v4178_v57 = vld [vmem:[%s4651_s7 + $0x58] sm:$0xff] }
 0x194   :  { %2220 = vmatpush.bf16.msrb.mxu2 %v3610_v3  ;;  %2233 = vmatpush.bf16.msrb.mxu3 %v3738_v6  ;;  %v3598_v3 = vor.u32 %v4120_v1, %v3595_v2  ;;  %v3726_v6 = vor.u32 %v4152_v54, %v3723_v55  ;;  %v4167_v1 = vld [vmem:[%s4651_s7] sm:$0xff] }
 0x195   :  { %2250 = vmatpush.bf16.msra.mxu0 %v3294_v8  ;;  %2263 = vmatpush.bf16.msra.mxu1 %v3422_v9  ;;  %v4148_v8 = vld [vmem:[#allocation5 + $0x36c] sm:$0xf]  ;;  %v3707_v9 = vld [vmem:[#allocation5 + $0x378] sm:$0xf0]  ;;  %v4175_v2 = vld [vmem:[%s4651_s7 + $0x40] sm:$0xff] }
 0x196   :  { %v3710_v11 = vor.u32 %v4148_v8, %v3707_v9 }
 0x198   :  { %2221 = vmatpush.bf16.msrb.mxu2 %v3594_v42  ;;  %2234 = vmatpush.bf16.msrb.mxu3 %v3722_v43  ;;  %v3566_v42 = vor.u32 %v4112_v12, %v3563_v13  ;;  %v3694_v43 = vor.u32 %v4144_v16, %v3691_v17 }
 0x199   :  { %2251 = vmatpush.bf16.msra.mxu0 %v3278_v19  ;;  %2264 = vmatpush.bf16.msra.mxu1 %v3406_v21  ;;  %v3547_v19 = vld [vmem:[#allocation5 + $0x238] sm:$0xf0]  ;;  %v4140_v21 = vld [vmem:[#allocation5 + $0x32c] sm:$0xf] }
 0x19a   :  { %v3550_v23 = vor.u32 %v4108_v18, %v3547_v19  ;;  %v3678_v24 = vor.u32 %v4140_v21, %v3675_v22 }
 0x19b   :  { %2174 = vmatmul.bf16.vlgmr.msra.gmra.mxu2 %v4501_v51  ;;  %2187 = vmatmul.bf16.vlgmr.msra.gmra.mxu3 %v4503_v52 }
 0x19c   :  { %2222 = vmatpush.bf16.msrb.mxu2 %v3578_v27  ;;  %2235 = vmatpush.bf16.msrb.mxu3 %v3706_v28  ;;  %v4104_v27 = vld [vmem:[#allocation5 + $0x20c] sm:$0xf]  ;;  %v3531_v28 = vld [vmem:[#allocation5 + $0x218] sm:$0xf0] }
 0x19d   :  { %2252 = vmatmul.bf16.vlgmr.msra.gmra.mxu0 %v4485_v25  ;;  %2265 = vmatmul.bf16.vlgmr.msra.gmra.mxu1 %v4487_v26  ;;  %v3530_v25 = vor.u32 %v4106_v45, %v3529_v44  ;;  %v3646_v26 = vor.u32 %v4132_v48, %v3643_v49  ;;  %v3534_v33 = vor.u32 %v4104_v27, %v3531_v28  ;;  %v4174_v45 = vld [vmem:[%s4651_s7 + $0x38] sm:$0xff]  ;;  %v4181_v48 = vld [vmem:[%s4651_s7 + $0x70] sm:$0xff] }
 0x19e   :  { %2642 = vmatpush.bf16.msrb.mxu0 %v4174_v45  ;;  %v4188_v45 = vld [vmem:[%s4651_s7 + $0xa8] sm:$0xff] }
 0x1a0   :  { %2223 = vmatpush.bf16.msrb.mxu2 %v3562_v15  ;;  %2236 = vmatpush.bf16.msrb.mxu3 %v3690_v35 }
 0x1a2   :  { %2643 = vmatpush.bf16.msrb.mxu0 %v4173_v47 }
 0x1a4   :  { %2224 = vmatpush.bf16.msrb.mxu2 %v3546_v40  ;;  %2237 = vmatpush.bf16.msrb.mxu3 %v3674_v41 }
 0x1a6   :  { %2644 = vmatpush.bf16.msrb.mxu0 %v4172_v53 }
 0x1a8   :  { %2225 = vmatpush.bf16.msrb.mxu2 %v3530_v25  ;;  %2238 = vmatpush.bf16.msrb.mxu3 %v3658_v20 }
 0x1ab   :  { %2226 = vmatmul.bf16.vlgmr.msrb.gmra.mxu2 %v4501_v51  ;;  %2239 = vmatmul.bf16.vlgmr.msrb.gmra.mxu3 %v4503_v52 }
 0x1ac   :  { %2270 = vmatpush.bf16.msra.mxu2 %v3646_v26  ;;  %2283 = vmatpush.bf16.msra.mxu3 %v3774_v14  ;;  %v4171_v26 = vld [vmem:[%s4651_s7 + $0x20] sm:$0xff] }
 0x1ad   :  { %v4179_v14 = vld [vmem:[%s4651_s7 + $0x60] sm:$0xff]  ;;  %2645 = vmatpush.bf16.msrb.mxu0 %v4171_v26 }
 0x1b0   :  { %2271 = vmatpush.bf16.msra.mxu2 %v3630_v59  ;;  %2284 = vmatpush.bf16.msra.mxu3 %v3758_v60  ;;  %v2301_v59 = vperm.slane %v4556_v4, 1  ;;  %v4169_v60 = vld [vmem:[%s4651_s7 + $0x10] sm:$0xff] }
 0x1b1   :  { %2646 = vmatpush.bf16.msrb.mxu0 %v4170_v56  ;;  %v4186_v56 = vld [vmem:[%s4651_s7 + $0x98] sm:$0xff] }
 0x1b2   :  { %v2308_v29 = vpack.c.bf16 %v2301_v59, %v2300_v58 }
 0x1b4   :  { %2272 = vmatpush.bf16.msra.mxu2 %v3614_v30  ;;  %2285 = vmatpush.bf16.msra.mxu3 %v3742_v0  ;;  %v4168_v30 = vld [vmem:[%s4651_s7 + $0x8] sm:$0xff]  ;;  %v2312_v54 = vunpack.c.l.b16 %v2308_v29  ;;  %v2313_v55 = vunpack.c.h.b16 %v2308_v29  ;;  %v2302_v29 = vperm.slane %v4556_v4, 2 }
 0x1b5   :  { %2647 = vmatpush.bf16.msrb.mxu0 %v4169_v60  ;;  %v4176_v0 = vld [vmem:[%s4651_s7 + $0x48] sm:$0xff] }
 0x1b6   :  { %v2316_v8 = vpack.c.b16 %v2312_v54, %v2312_v54  ;;  %v2317_v9 = vpack.c.b16 %v2313_v55, %v2313_v55  ;;  %v4183_v54 = vld [vmem:[%s4651_s7 + $0x80] sm:$0xff] }
 0x1b8   :  { %2273 = vmatpush.bf16.msra.mxu2 %v3598_v3  ;;  %2286 = vmatpush.bf16.msra.mxu3 %v3726_v6  ;;  %v2321_v16 = vpack.i.b16 %v2316_v8, %v2316_v8  ;;  %v2325_v17 = vpack.i.b16 %v2317_v9, %v2317_v9 }
 0x1b9   :  { %2648 = vmatpush.bf16.msrb.mxu0 %v4168_v30  ;;  %v2303_v30 = vperm.slane %v4556_v4, 3  ;;  %v4191_v4 = vld [vmem:[%s4651_s7 + $0xc0] sm:$0xff] }
 0x1ba   :  { %v2323_v22 = vperm.slane %v2321_v16, 0 }
 0x1bc   :  { %2274 = vmatpush.bf16.msra.mxu2 %v3582_v10  ;;  %2287 = vmatpush.bf16.msra.mxu3 %v3710_v11  ;;  %v4189_v10 = vld [vmem:[%s4651_s7 + $0xb0] sm:$0xff] }
 0x1bd   :  { %2649 = vmatpush.bf16.msrb.mxu0 %v4167_v1  ;;  %v4197_v11 = vld [vmem:[%s4651_s7 + $0xf0] sm:$0xff]  ;;  %v4192_v1 = vld [vmem:[%s4651_s7 + $0xc8] sm:$0xff] }
 0x1c0   :  { %2275 = vmatpush.bf16.msra.mxu2 %v3566_v42  ;;  %2288 = vmatpush.bf16.msra.mxu3 %v3694_v43 }
 0x1c4   :  { %2276 = vmatpush.bf16.msra.mxu2 %v3550_v23  ;;  %2289 = vmatpush.bf16.msra.mxu3 %v3678_v24  ;;  %v2327_v23 = vperm.slane %v2325_v17, 0 }
 0x1c8   :  { %2277 = vmatpush.bf16.msra.mxu2 %v3534_v33  ;;  %2290 = vmatpush.bf16.msra.mxu3 %v3662_v34  ;;  %v2340_v33 = vunpack.c.l.bf16 %v2323_v22  ;;  %v2341_v34 = vunpack.c.l.bf16 %v2327_v23 }
 0x1cb   :  { %2278 = vmatmul.bf16.vlgmr.msra.gmra.mxu2 %v4501_v51  ;;  %2291 = vmatmul.bf16.vlgmr.msra.gmra.mxu3 %v4503_v52  ;;  %v4182_v51 = vld [vmem:[%s4651_s7 + $0x78] sm:$0xff] }
 0x1cc   :  { %2655 = vmatpush.bf16.msrb.mxu1 %v4182_v51  ;;  %2668 = vmatpush.bf16.msrb.mxu2 %v4190_v7  ;;  %v4196_v51 = vld [vmem:[%s4651_s7 + $0xe8] sm:$0xff] }
 0x1cd   :  { %2681 = vmatpush.bf16.msrb.mxu3 %v4198_v5 }
 0x1d0   :  { %2656 = vmatpush.bf16.msrb.mxu1 %v4181_v48  ;;  %2669 = vmatpush.bf16.msrb.mxu2 %v4189_v10 }
 0x1d1   :  { %2682 = vmatpush.bf16.msrb.mxu3 %v4197_v11 }
 0x1d4   :  { %2657 = vmatpush.bf16.msrb.mxu1 %v4180_v50  ;;  %2670 = vmatpush.bf16.msrb.mxu2 %v4188_v45  ;;  %v4187_v50 = vld [vmem:[%s4651_s7 + $0xa0] sm:$0xff] }
 0x1d5   :  { %2683 = vmatpush.bf16.msrb.mxu3 %v4196_v51 }
 0x1d8   :  { %v2097_v15 = vpop.f32.mrf.mxu0  ;;  %v2110_v35 = vpop.f32.mrf.mxu1  ;;  %2658 = vmatpush.bf16.msrb.mxu1 %v4179_v14  ;;  %2671 = vmatpush.bf16.msrb.mxu2 %v4187_v50 }
 0x1d9   :  { %v4515_v36 = vadd.f32 %v2110_v35, %v2097_v15 }
 0x1dc   :  { %2659 = vmatpush.bf16.msrb.mxu1 %v4178_v57  ;;  %v4194_v57 = vld [vmem:[%s4651_s7 + $0xd8] sm:$0xff]  ;;  %2672 = vmatpush.bf16.msrb.mxu2 %v4186_v56 }
 0x1e0   :  { %v2099_v37 = vpop.f32.mrf.mxu0  ;;  %v2112_v38 = vpop.f32.mrf.mxu1  ;;  %2660 = vmatpush.bf16.msrb.mxu1 %v4177_v61 }
 0x1e4   :  { %2661 = vmatpush.bf16.msrb.mxu1 %v4176_v0  ;;  %v4184_v0 = vld [vmem:[%s4651_s7 + $0x88] sm:$0xff] }
 0x1e8   :  { %v4517_v39 = vpop.f32.mrf.mxu0  ;;  %v4519_v40 = vpop.f32.mrf.mxu1  ;;  %2662 = vmatpush.bf16.msrb.mxu1 %v4175_v2  ;;  %v2309_v2 = vpack.c.bf16 %v2303_v30, %v2302_v29 }
 0x1e9   :  { %v2163_v42 = vadd.f32 %v4519_v40, %v4517_v39 }
 0x1ea   :  { %v2314_v55 = vunpack.c.l.b16 %v2309_v2 }
 0x1f0   :  { %v2151_v41 = vpop.f32.mrf.mxu0  ;;  %v2164_v44 = vpop.f32.mrf.mxu1 }
 0x1f8   :  { %v2201_v52 = vpop.f32.mrf.mxu0  ;;  %v2214_v46 = vpop.f32.mrf.mxu1 }
 0x1f9   :  { %v4533_v49 = vadd.f32 %v2214_v46, %v2201_v52 }
 0x200   :  { %v2203_v25 = vpop.f32.mrf.mxu0  ;;  %v2216_v20 = vpop.f32.mrf.mxu1 }
 0x201   :  { %v4195_v25 = vld [vmem:[%s4651_s7 + $0xe0] sm:$0xff] }
 0x202   :  { %2684 = vmatpush.bf16.msrb.mxu3 %v4195_v25 }
 0x206   :  { %2685 = vmatpush.bf16.msrb.mxu3 %v4194_v57 }
 0x20e   :  { %v2123_v62 = vpop.f32.mrf.mxu2  ;;  %v2136_v63 = vpop.f32.mrf.mxu3 }
 0x20f   :  { %v2124_v43 = vadd.f32 %v2123_v62, %v4515_v36  ;;  %v4185_v62 = vld [vmem:[%s4651_s7 + $0x90] sm:$0xff] }
 0x210   :  { %2673 = vmatpush.bf16.msrb.mxu2 %v4185_v62 }
 0x211   :  { %v2137_v24 = vadd.f32 %v2136_v63, %v2124_v43  ;;  %v4193_v63 = vld [vmem:[%s4651_s7 + $0xd0] sm:$0xff] }
 0x212   :  { %2686 = vmatpush.bf16.msrb.mxu3 %v4193_v63 }
 0x214   :  { %2674 = vmatpush.bf16.msrb.mxu2 %v4184_v0 }
 0x216   :  { %v2125_v3 = vpop.f32.mrf.mxu2  ;;  %v2138_v6 = vpop.f32.mrf.mxu3  ;;  %2687 = vmatpush.bf16.msrb.mxu3 %v4192_v1 }
 0x217   :  { %v2315_v3 = vunpack.c.h.b16 %v2309_v2  ;;  %v2318_v6 = vpack.c.b16 %v2314_v55, %v2314_v55 }
 0x218   :  { %2675 = vmatpush.bf16.msrb.mxu2 %v4183_v54 }
 0x219   :  { %v2319_v7 = vpack.c.b16 %v2315_v3, %v2315_v3  ;;  %v2329_v5 = vpack.i.b16 %v2318_v6, %v2318_v6 }
 0x21a   :  { %v4590_v12 = vpop.f32.mrf.mxu0  ;;  %v4592_v13 = vpop.f32.mrf.mxu1  ;;  %2688 = vmatpush.bf16.msrb.mxu3 %v4191_v4 }
 0x21b   :  { %v2333_v8 = vpack.i.b16 %v2319_v7, %v2319_v7  ;;  %v2267_v9 = vadd.f32 %v4592_v13, %v4590_v12 }
 0x21d   :  { %v2335_v43 = vperm.slane %v2333_v8, 0 }
 0x21e   :  { %v2175_v18 = vpop.f32.mrf.mxu2  ;;  %v2188_v19 = vpop.f32.mrf.mxu3 }
 0x21f   :  { %v2176_v21 = vadd.f32 %v2175_v18, %v2163_v42  ;;  %v2331_v42 = vperm.slane %v2329_v5, 0  ;;  %v2343_v23 = vunpack.c.l.bf16 %v2335_v43 }
 0x221   :  { %v2189_v27 = vadd.f32 %v2188_v19, %v2176_v21  ;;  %v2342_v22 = vunpack.c.l.bf16 %v2331_v42 }
 0x222   :  { %v2255_v28 = vpop.f32.mrf.mxu0  ;;  %v2268_v31 = vpop.f32.mrf.mxu1 }
 0x223   :  { %v2296_v32 = vpack.c.bf16 %v2189_v27, %v2137_v24 }
 0x225   :  { %v2336_v15 = vunpack.c.l.bf16 %v2296_v32  ;;  %v2337_v35 = vunpack.c.h.bf16 %v2296_v32 }
 0x226   :  { %v2177_v37 = vpop.f32.mrf.mxu2  ;;  %v2190_v38 = vpop.f32.mrf.mxu3 }
 0x227   :  { %v2344_v41 = vadd.f32 %v2340_v33, %v2336_v15  ;;  %v2345_v39 = vadd.f32 %v2341_v34, %v2337_v35 }
 0x229   :  { %v2348_v40 = vpack.c.bf16 %v2345_v39, %v2344_v41 }
 0x22b   :  { %v2350_v36 = vunpack.c.l.bf16 %v2348_v40  ;;  %v2351_v44 = vunpack.c.h.bf16 %v2348_v40 }
 0x22d   :  { %v2358_v52 = vmul.f32 0.100097656, %v2350_v36  ;;  %v2359_v46 = vmul.f32 0.100097656, %v2351_v44  ;;  %vm2354_vm13 = vcmp.gt.f32.partialorder %v2350_v36, 0.0  ;;  %vm2355_vm14 = vcmp.gt.f32.partialorder %v2351_v44, 0.0 }
 0x22e   :  { %v2227_v47 = vpop.f32.mrf.mxu2  ;;  %v2240_v48 = vpop.f32.mrf.mxu3  ;;  %vm2364_vm15 = vmpackc.low %vm2355_vm14, %vm2354_vm13 }
 0x22f   :  { %v2362_v53 = vpack.c.bf16 %v2359_v46, %v2358_v52  ;;  %v2228_v10 = vadd.f32 %v2227_v47, %v4533_v49  ;;  %v4204_v52 = vld [vmem:[%s4652_s8] ss:$0 sm:$0xff] }
 0x231   :  { %v2366_v20 = vsel %vm2364_vm15, %v2348_v40, %v2362_v53  ;;  %v2241_v18 = vadd.f32 %v2240_v48, %v2228_v10 }
 0x232   :  { %v2438_v26 = vunpack.c.l.b16 %v2366_v20  ;;  %v2439_v14 = vunpack.c.h.b16 %v2366_v20 }
 0x234   :  { %v2442_v58 = vpack.c.b16 %v2438_v26, %v2438_v26  ;;  %v2443_v59 = vpack.c.b16 %v2439_v14, %v2439_v14 }
 0x236   :  { %v2229_v60 = vpop.f32.mrf.mxu2  ;;  %v2242_v61 = vpop.f32.mrf.mxu3  ;;  %2650 = vmatmul.bf16.vlgmr.msrb.gmra.mxu0 %v2442_v58  ;;  %2663 = vmatmul.bf16.vlgmr.msrb.gmra.mxu1 %v2443_v59 }
 0x24e   :  { %v2279_v11 = vpop.f32.mrf.mxu2  ;;  %v2292_v16 = vpop.f32.mrf.mxu3 }
 0x24f   :  { %v2280_v17 = vadd.f32 %v2279_v11, %v2267_v9 }
 0x251   :  { %v2293_v19 = vadd.f32 %v2292_v16, %v2280_v17 }
 0x253   :  { %v2297_v21 = vpack.c.bf16 %v2293_v19, %v2241_v18 }
 0x255   :  { %v2338_v24 = vunpack.c.l.bf16 %v2297_v21  ;;  %v2339_v27 = vunpack.c.h.bf16 %v2297_v21 }
 0x256   :  { %v2281_v28 = vpop.f32.mrf.mxu2  ;;  %v2294_v31 = vpop.f32.mrf.mxu3 }
 0x257   :  { %v2346_v32 = vadd.f32 %v2342_v22, %v2338_v24  ;;  %v2347_v33 = vadd.f32 %v2343_v23, %v2339_v27 }
 0x259   :  { %v2349_v34 = vpack.c.bf16 %v2347_v33, %v2346_v32 }
 0x25b   :  { %v2352_v12 = vunpack.c.l.bf16 %v2349_v34  ;;  %v2353_v13 = vunpack.c.h.bf16 %v2349_v34 }
 0x25d   :  { %v2360_v49 = vmul.f32 0.100097656, %v2352_v12  ;;  %v2361_v15 = vmul.f32 0.100097656, %v2353_v13  ;;  %vm2356_vm0 = vcmp.gt.f32.partialorder %v2352_v12, 0.0  ;;  %vm2357_vm1 = vcmp.gt.f32.partialorder %v2353_v13, 0.0 }
 0x25e   :  { %vm2365_vm2 = vmpackc.low %vm2357_vm1, %vm2356_vm0 }
 0x25f   :  { %v2363_v35 = vpack.c.bf16 %v2361_v15, %v2360_v49 }
 0x261   :  { %v2367_v37 = vsel %vm2365_vm2, %v2349_v34, %v2363_v35 }
 0x262   :  { %v2440_v38 = vunpack.c.l.b16 %v2367_v37  ;;  %v2441_v41 = vunpack.c.h.b16 %v2367_v37 }
 0x264   :  { %v2444_v39 = vpack.c.b16 %v2440_v38, %v2440_v38  ;;  %v2445_v40 = vpack.c.b16 %v2441_v41, %v2441_v41 }
 0x266   :  { %2676 = vmatmul.bf16.vlgmr.msrb.gmra.mxu2 %v2444_v39  ;;  %2689 = vmatmul.bf16.vlgmr.msrb.gmra.mxu3 %v2445_v40 }
 0x2b3   :  { %v2651_v36 = vpop.f32.mrf.mxu0  ;;  %v2664_v44 = vpop.f32.mrf.mxu1 }
 0x2b4   :  { %v2652_v46 = vadd.f32 %v4204_v52, %v2651_v36 }
 0x2b6   :  { %v2665_v47 = vadd.f32 %v2664_v44, %v2652_v46 }
 0x2bb   :  { %v2653_v45 = vpop.f32.mrf.mxu0  ;;  %v2666_v51 = vpop.f32.mrf.mxu1 }
 0x2e9   :  { %v2677_v48 = vpop.f32.mrf.mxu2  ;;  %v2690_v53 = vpop.f32.mrf.mxu3 }
 0x2ea   :  { %v2678_v50 = vadd.f32 %v2677_v48, %v2665_v47 }
 0x2ec   :  { %v2691_v25 = vadd.f32 %v2690_v53, %v2678_v50 }
 0x2ee   :  { %4205 = vtanh.f32 %v2691_v25 }
 0x2f1   :  { %v2679_v20 = vpop.f32.mrf.mxu2  ;;  %v2692_v26 = vpop.f32.mrf.mxu3 }
 0x2f4   :  { %v4206_v14 = vpop.eup %4205 }
 0x2f5   :  { %2696 = vst.msk [vmem:[#allocation7] sm:$0xff] %vm2695_vm3, %v4206_v14 }
 0x2f6   :  { %2707 = dma.vmem_to_hbm [thread:$0]  %s2703_s3, 128, %s2705_s23, [#allocation4]  }
 0x2f7   :  { %4283 = dma.done.wait [#allocation4], 128  }
 0x2f8   :  { %4284 = vsyncadd [#allocation4], 4294967168 }
 0x2f9   :  { %2712 = vsyncpa [#allocation3], 1 }
 0x2fa   :  { %2713 = vsyncpa [#allocation6], 1 }
 0x2fb   :  { %2714 = vsyncpa [#allocation4], 1 }

</bundles_post_ra>
